<compile_context>
chip_gen: v7x
topology: tpu7x:2x2x1
jax: 0.10.0
libtpu: 0.0.40
codegen_flags: <defaults>
</compile_context>

<pallas_src>
import jax
import jax.numpy as jnp
from jax.experimental import pallas as pl
from jax.experimental.pallas import tpu as pltpu


# ----------------------------------------------------------------------------
# Pass 1: per-row-tile feature_proj + type embedding + message_proj
# ----------------------------------------------------------------------------
def proj_kernel(x_ref, temb_ref, w1_ref, b1_ref, w2_ref, b2_ref, h_ref, m_ref):
    # clip once, cast once per tile for the MXU
    x = jnp.clip(x_ref[...], -10.0, 10.0).astype(jnp.bfloat16)

    # feature_proj: Linear + BN(eval, folded) + ReLU + Dropout(identity)
    h = jnp.dot(x, w1_ref[...], preferred_element_type=jnp.float32) + b1_ref[...]
    h = jnp.maximum(h, 0.0)

    # + 0.1 * node_type_embedding (0.1 folded into temb on host)
    h = h + temb_ref[...]

    # message_proj: Linear + BN(eval, folded) + ReLU
    m = jnp.dot(h.astype(jnp.bfloat16), w2_ref[...],
                preferred_element_type=jnp.float32) + b2_ref[...]
    m = jnp.maximum(m, 0.0)

    h_ref[...] = h
    m_ref[...] = m.astype(jnp.bfloat16)


# ----------------------------------------------------------------------------
# Pass 2: degree-normalized aggregation + output_proj + graph readout
# ----------------------------------------------------------------------------
def aggregate_kernel(a_ref, m_ref, h_ref, w3_ref, b3_ref,
                     z_ref, hg_ref, acc_ref, deg_ref):
    i = pl.program_id(0)
    k = pl.program_id(1)

    @pl.when((i == 0) & (k == 0))
    def _():
        hg_ref[...] = jnp.zeros_like(hg_ref)

    @pl.when(k == 0)
    def _():
        acc_ref[...] = jnp.zeros_like(acc_ref)
        deg_ref[...] = jnp.zeros_like(deg_ref)

    # clip to [0,1] on the loaded tile, then feed bf16 to the MXU
    a = jnp.clip(a_ref[...], 0.0, 1.0)
    deg_ref[...] += jnp.sum(a, axis=1, keepdims=True)
    acc_ref[...] += jnp.dot(a.astype(jnp.bfloat16), m_ref[...],
                            preferred_element_type=jnp.float32)

    @pl.when(k == pl.num_programs(1) - 1)
    def _():
        # post-matmul row scale: diag(1/deg) @ (A @ M) == (A/deg) @ M
        inv_deg = pl.reciprocal(deg_ref[...] + 1e-8, approx=True)
        zp = h_ref[...] + acc_ref[...] * inv_deg

        # output_proj: Linear + BN(eval, folded) + Tanh
        z = jnp.dot(zp.astype(jnp.bfloat16), w3_ref[...],
                    preferred_element_type=jnp.float32) + b3_ref[...]
        z = jnp.tanh(z)

        z_ref[...] = z
        # partial column-sum for h_G, accumulated into the resident (1, hidden) block
        hg_ref[...] += jnp.sum(z, axis=0, keepdims=True)


# ----------------------------------------------------------------------------
# Wrapper
# ----------------------------------------------------------------------------
def gnn_encoder(A, X, node_types, params, *, tile_n=128):
    n, d_in = X.shape
    hidden = params["w1"].shape[1]
    emb_dim = params["emb"].shape[1]
    assert n % tile_n == 0, "node count must be a multiple of the row tile"
    num_i = n // tile_n
    num_k = n // tile_n

    # host-side embedding gather; fold the 0.1 scale and zero-pad to hidden width
    temb = 0.1 * jnp.take(params["emb"], node_types, axis=0)          # [n, emb_dim]
    temb = jnp.pad(temb, ((0, 0), (0, hidden - emb_dim)))             # [n, hidden]

    # ---- pass 1: H, M -------------------------------------------------------
    cost1 = pl.CostEstimate(
        flops=2 * n * hidden * (d_in + hidden),
        transcendentals=0,
        bytes_accessed=(4 * n * d_in + 4 * n * hidden                  # X, temb
                        + 2 * (d_in * hidden + hidden * hidden)        # bf16 weights
                        + 2 * 4 * hidden                               # biases
                        + 4 * n * hidden + 2 * n * hidden),            # H, M outputs
    )
    H, M = pl.pallas_call(
        proj_kernel,
        out_shape=(
            jax.ShapeDtypeStruct((n, hidden), jnp.float32),
            jax.ShapeDtypeStruct((n, hidden), jnp.bfloat16),
        ),
        grid=(num_i,),
        in_specs=[
            pl.BlockSpec((tile_n, d_in), lambda i: (i, 0)),
            pl.BlockSpec((tile_n, hidden), lambda i: (i, 0)),
            pl.BlockSpec((d_in, hidden), lambda i: (0, 0)),
            pl.BlockSpec((1, hidden), lambda i: (0, 0)),
            pl.BlockSpec((hidden, hidden), lambda i: (0, 0)),
            pl.BlockSpec((1, hidden), lambda i: (0, 0)),
        ],
        out_specs=(
            pl.BlockSpec((tile_n, hidden), lambda i: (i, 0)),
            pl.BlockSpec((tile_n, hidden), lambda i: (i, 0)),
        ),
        compiler_params=pltpu.CompilerParams(dimension_semantics=("parallel",)),
        cost_estimate=cost1,
    )(X, temb, params["w1"], params["b1"], params["w2"], params["b2"])

    # ---- pass 2: Z, h_G -----------------------------------------------------
    cost2 = pl.CostEstimate(
        flops=2 * n * n * hidden + 2 * n * hidden * hidden,
        transcendentals=n * hidden + n,
        bytes_accessed=(4 * n * n                                      # A
                        + 2 * n * hidden + 4 * n * hidden              # M, H
                        + 2 * hidden * hidden + 4 * hidden             # W3, b3
                        + 4 * n * hidden + 4 * hidden),                # Z, hG
    )
    Z, hg_sum = pl.pallas_call(
        aggregate_kernel,
        out_shape=(
            jax.ShapeDtypeStruct((n, hidden), jnp.float32),
            jax.ShapeDtypeStruct((1, hidden), jnp.float32),
        ),
        grid=(num_i, num_k),
        in_specs=[
            pl.BlockSpec((tile_n, tile_n), lambda i, k: (i, k)),
            pl.BlockSpec((tile_n, hidden), lambda i, k: (k, 0)),
            pl.BlockSpec((tile_n, hidden), lambda i, k: (i, 0)),
            pl.BlockSpec((hidden, hidden), lambda i, k: (0, 0)),
            pl.BlockSpec((1, hidden), lambda i, k: (0, 0)),
        ],
        out_specs=(
            pl.BlockSpec((tile_n, hidden), lambda i, k: (i, 0)),
            pl.BlockSpec((1, hidden), lambda i, k: (0, 0)),
        ),
        scratch_shapes=[
            pltpu.VMEM((tile_n, hidden), jnp.float32),   # A@M accumulator
            pltpu.VMEM((tile_n, 1), jnp.float32),        # degree accumulator
        ],
        # i is kept "arbitrary" because the resident hG block accumulates across row tiles
        compiler_params=pltpu.CompilerParams(
            dimension_semantics=("arbitrary", "arbitrary")),
        cost_estimate=cost2,
    )(A, M, H, params["w3"], params["b3"])

    hG = hg_sum / n
    return Z, hG


# ----------------------------------------------------------------------------
# Parameter init mirroring GNNEncoder._init_weights (eval mode), with BN folded
# ----------------------------------------------------------------------------
def init_params(key, input_dim, hidden_dim, num_node_types=5):
    k_emb, k1, k2, k3 = jax.random.split(key, 4)

    # BN eval fold: gamma=1, beta=0, running_mean=0, running_var=1
    bn_scale = 1.0 / jnp.sqrt(jnp.float32(1.0 + 1e-5))

    def folded_linear(k, fan_in, fan_out):
        # kaiming_normal_(mode='fan_in', nonlinearity='relu'): std = sqrt(2 / fan_in)
        std = (2.0 / fan_in) ** 0.5
        w = std * jax.random.normal(k, (fan_in, fan_out), dtype=jnp.float32)  # [in, out]
        b = jnp.zeros((1, fan_out), dtype=jnp.float32)
        w_folded = (w * bn_scale).astype(jnp.bfloat16)     # BN scale into weights (bf16 for MXU)
        b_folded = b * bn_scale                            # BN scale into bias (stays f32)
        return w_folded, b_folded

    w1, b1 = folded_linear(k1, input_dim, hidden_dim)
    w2, b2 = folded_linear(k2, hidden_dim, hidden_dim)
    w3, b3 = folded_linear(k3, hidden_dim, hidden_dim)

    emb_dim = hidden_dim // 4
    emb = 0.01 * jax.random.normal(k_emb, (num_node_types, emb_dim), dtype=jnp.float32)

    return dict(emb=emb, w1=w1, b1=b1, w2=w2, b2=b2, w3=w3, b3=b3)


if __name__ == "__main__":
    n = 256            # number of graph nodes (2 row tiles of 128)
    input_dim = 16
    hidden_dim = 128   # lane-dense feature width
    num_node_types = 5

    key = jax.random.PRNGKey(0)
    k_a, k_x, k_p = jax.random.split(key, 3)

    # binary adjacency; features ~ N(0, 4)
    A = (jax.random.uniform(k_a, (n, n), dtype=jnp.float32) > 0.7).astype(jnp.float32)
    X = 2.0 * jax.random.normal(k_x, (n, input_dim), dtype=jnp.float32)
    node_types = jnp.arange(n, dtype=jnp.int32) % num_node_types

    params = init_params(k_p, input_dim, hidden_dim, num_node_types)

    Z, hG = jax.jit(gnn_encoder)(A, X, node_types, params)
    jax.block_until_ready((Z, hG))

    assert Z.shape == (n, hidden_dim) and hG.shape == (1, hidden_dim)
    assert bool(jnp.all(jnp.isfinite(Z))) and bool(jnp.all(jnp.isfinite(hG)))
    print("KERNEL_OK")
</pallas_src>

<mosaic_0001>
module attributes {stable_mosaic.version = 11 : i64} {
  func.func @proj_kernel(%arg0: i32, %arg1: memref<128x16xf32, #tpu.memory_space<vmem>>, %arg2: memref<128x128xf32, #tpu.memory_space<vmem>>, %arg3: memref<16x128xbf16, #tpu.memory_space<vmem>>, %arg4: memref<1x128xf32, #tpu.memory_space<vmem>>, %arg5: memref<128x128xbf16, #tpu.memory_space<vmem>>, %arg6: memref<1x128xf32, #tpu.memory_space<vmem>>, %arg7: memref<128x128xf32, #tpu.memory_space<vmem>>, %arg8: memref<128x128xbf16, #tpu.memory_space<vmem>>) attributes {dimension_semantics = [#tpu.dimension_semantics<parallel>], iteration_bounds = array<i64: 2>, scalar_prefetch = 0 : i64, scratch_operands = 0 : i64, tpu.core_type = #tpu.core_type<tc>, window_params = [{transform_indices = @transform_0, window_bounds = array<i64: 128, 16>}, {transform_indices = @transform_1, window_bounds = array<i64: 128, 128>}, {pipeline_mode = #tpu.pipeline_mode<synchronous>, transform_indices = @transform_2, window_bounds = array<i64: 16, 128>}, {pipeline_mode = #tpu.pipeline_mode<synchronous>, transform_indices = @transform_3, window_bounds = array<i64: 1, 128>}, {pipeline_mode = #tpu.pipeline_mode<synchronous>, transform_indices = @transform_4, window_bounds = array<i64: 128, 128>}, {pipeline_mode = #tpu.pipeline_mode<synchronous>, transform_indices = @transform_5, window_bounds = array<i64: 1, 128>}, {transform_indices = @transform_6, window_bounds = array<i64: 128, 128>}, {transform_indices = @transform_7, window_bounds = array<i64: 128, 128>}]} {
    %c0 = arith.constant 0 : index
    %c0_0 = arith.constant 0 : index
    %0 = vector.load %arg1[%c0, %c0_0] : memref<128x16xf32, #tpu.memory_space<vmem>>, vector<128x16xf32>
    %cst = arith.constant -1.000000e+01 : f32
    %cst_1 = arith.constant 1.000000e+01 : f32
    %1 = vector.broadcast %cst : f32 to vector<128x16xf32>
    %2 = arith.maximumf %1, %0 : vector<128x16xf32>
    %3 = vector.broadcast %cst_1 : f32 to vector<128x16xf32>
    %4 = arith.minimumf %3, %2 : vector<128x16xf32>
    %5 = arith.truncf %4 : vector<128x16xf32> to vector<128x16xbf16>
    %c0_2 = arith.constant 0 : index
    %c0_3 = arith.constant 0 : index
    %6 = vector.load %arg3[%c0_2, %c0_3] : memref<16x128xbf16, #tpu.memory_space<vmem>>, vector<16x128xbf16>
    %cst_4 = arith.constant dense<0.000000e+00> : vector<128x128xf32>
    %7 = tpu.matmul %5, %6, %cst_4 {dimension_numbers = #tpu.dot_dimension_numbers<[1], [0], [0], [1], [0, 0, 1, 1], [], []>} : vector<128x16xbf16>, vector<16x128xbf16>, vector<128x128xf32> -> vector<128x128xf32>
    %c0_5 = arith.constant 0 : index
    %c0_6 = arith.constant 0 : index
    %8 = vector.load %arg4[%c0_5, %c0_6] : memref<1x128xf32, #tpu.memory_space<vmem>>, vector<1x128xf32>
    %9 = vector.broadcast %8 : vector<1x128xf32> to vector<128x128xf32>
    %10 = arith.addf %7, %9 : vector<128x128xf32>
    %cst_7 = arith.constant 0.000000e+00 : f32
    %11 = vector.broadcast %cst_7 : f32 to vector<128x128xf32>
    %12 = arith.maximumf %10, %11 : vector<128x128xf32>
    %c0_8 = arith.constant 0 : index
    %c0_9 = arith.constant 0 : index
    %13 = vector.load %arg2[%c0_8, %c0_9] : memref<128x128xf32, #tpu.memory_space<vmem>>, vector<128x128xf32>
    %14 = arith.addf %12, %13 : vector<128x128xf32>
    %15 = arith.truncf %14 : vector<128x128xf32> to vector<128x128xbf16>
    %c0_10 = arith.constant 0 : index
    %c0_11 = arith.constant 0 : index
    %16 = vector.load %arg5[%c0_10, %c0_11] : memref<128x128xbf16, #tpu.memory_space<vmem>>, vector<128x128xbf16>
    %cst_12 = arith.constant dense<0.000000e+00> : vector<128x128xf32>
    %17 = tpu.matmul %15, %16, %cst_12 {dimension_numbers = #tpu.dot_dimension_numbers<[1], [0], [0], [1], [0, 0, 1, 1], [], []>} : vector<128x128xbf16>, vector<128x128xbf16>, vector<128x128xf32> -> vector<128x128xf32>
    %c0_13 = arith.constant 0 : index
    %c0_14 = arith.constant 0 : index
    %18 = vector.load %arg6[%c0_13, %c0_14] : memref<1x128xf32, #tpu.memory_space<vmem>>, vector<1x128xf32>
    %19 = vector.broadcast %18 : vector<1x128xf32> to vector<128x128xf32>
    %20 = arith.addf %17, %19 : vector<128x128xf32>
    %cst_15 = arith.constant 0.000000e+00 : f32
    %21 = vector.broadcast %cst_15 : f32 to vector<128x128xf32>
    %22 = arith.maximumf %20, %21 : vector<128x128xf32>
    %c0_16 = arith.constant 0 : index
    %c0_17 = arith.constant 0 : index
    %23 = vector.load %arg7[%c0_16, %c0_17] : memref<128x128xf32, #tpu.memory_space<vmem>>, vector<128x128xf32>
    tpu.vector_store %arg7[%c0_16, %c0_17], %14 {strides = array<i32>} : memref<128x128xf32, #tpu.memory_space<vmem>>, vector<128x128xf32>,
    %24 = arith.truncf %22 : vector<128x128xf32> to vector<128x128xbf16>
    %c0_18 = arith.constant 0 : index
    %c0_19 = arith.constant 0 : index
    %25 = vector.load %arg8[%c0_18, %c0_19] : memref<128x128xbf16, #tpu.memory_space<vmem>>, vector<128x128xbf16>
    tpu.vector_store %arg8[%c0_18, %c0_19], %24 {strides = array<i32>} : memref<128x128xbf16, #tpu.memory_space<vmem>>, vector<128x128xbf16>,
    return
  }
  func.func @transform_0(%arg0: i32) -> (i32, i32) {
    %c0_i32 = arith.constant 0 : i32
    %c0_i32_0 = arith.constant 0 : i32
    return %arg0, %c0_i32 : i32, i32
  }
  func.func @transform_1(%arg0: i32) -> (i32, i32) {
    %c0_i32 = arith.constant 0 : i32
    %c0_i32_0 = arith.constant 0 : i32
    return %arg0, %c0_i32 : i32, i32
  }
  func.func @transform_2(%arg0: i32) -> (i32, i32) {
    %c0_i32 = arith.constant 0 : i32
    %c0_i32_0 = arith.constant 0 : i32
    %c0_i32_1 = arith.constant 0 : i32
    return %c0_i32, %c0_i32_0 : i32, i32
  }
  func.func @transform_3(%arg0: i32) -> (i32, i32) {
    %c0_i32 = arith.constant 0 : i32
    %c0_i32_0 = arith.constant 0 : i32
    %c0_i32_1 = arith.constant 0 : i32
    return %c0_i32, %c0_i32_0 : i32, i32
  }
  func.func @transform_4(%arg0: i32) -> (i32, i32) {
    %c0_i32 = arith.constant 0 : i32
    %c0_i32_0 = arith.constant 0 : i32
    %c0_i32_1 = arith.constant 0 : i32
    return %c0_i32, %c0_i32_0 : i32, i32
  }
  func.func @transform_5(%arg0: i32) -> (i32, i32) {
    %c0_i32 = arith.constant 0 : i32
    %c0_i32_0 = arith.constant 0 : i32
    %c0_i32_1 = arith.constant 0 : i32
    return %c0_i32, %c0_i32_0 : i32, i32
  }
  func.func @transform_6(%arg0: i32) -> (i32, i32) {
    %c0_i32 = arith.constant 0 : i32
    %c0_i32_0 = arith.constant 0 : i32
    return %arg0, %c0_i32 : i32, i32
  }
  func.func @transform_7(%arg0: i32) -> (i32, i32) {
    %c0_i32 = arith.constant 0 : i32
    %c0_i32_0 = arith.constant 0 : i32
    return %arg0, %c0_i32 : i32, i32
  }
}

module attributes {stable_mosaic.version = 11 : i64} {
  func.func @aggregate_kernel(%arg0: i32, %arg1: i32, %arg2: memref<128x128xf32, #tpu.memory_space<vmem>>, %arg3: memref<128x128xbf16, #tpu.memory_space<vmem>>, %arg4: memref<128x128xf32, #tpu.memory_space<vmem>>, %arg5: memref<128x128xbf16, #tpu.memory_space<vmem>>, %arg6: memref<1x128xf32, #tpu.memory_space<vmem>>, %arg7: memref<128x128xf32, #tpu.memory_space<vmem>>, %arg8: memref<1x128xf32, #tpu.memory_space<vmem>>, %arg9: memref<128x128xf32, #tpu.memory_space<vmem>>, %arg10: memref<128x1xf32, #tpu.memory_space<vmem>>) attributes {dimension_semantics = [#tpu.dimension_semantics<arbitrary>, #tpu.dimension_semantics<arbitrary>], iteration_bounds = array<i64: 2, 2>, scalar_prefetch = 0 : i64, scratch_operands = 2 : i64, tpu.core_type = #tpu.core_type<tc>, window_params = [{transform_indices = @transform_0, window_bounds = array<i64: 128, 128>}, {transform_indices = @transform_1, window_bounds = array<i64: 128, 128>}, {transform_indices = @transform_2, window_bounds = array<i64: 128, 128>}, {pipeline_mode = #tpu.pipeline_mode<synchronous>, transform_indices = @transform_3, window_bounds = array<i64: 128, 128>}, {pipeline_mode = #tpu.pipeline_mode<synchronous>, transform_indices = @transform_4, window_bounds = array<i64: 1, 128>}, {transform_indices = @transform_5, window_bounds = array<i64: 128, 128>}, {pipeline_mode = #tpu.pipeline_mode<synchronous>, transform_indices = @transform_6, window_bounds = array<i64: 1, 128>}]} {
    %c0_i32 = arith.constant 0 : i32
    %0 = arith.cmpi eq, %arg0, %c0_i32 : i32
    %c0_i32_0 = arith.constant 0 : i32
    %1 = arith.cmpi eq, %arg1, %c0_i32_0 : i32
    %2 = arith.andi %0, %1 : i1
    %3 = arith.extui %2 : i1 to i32
    %c0_i32_1 = arith.constant 0 : i32
    %4 = arith.cmpi ne, %3, %c0_i32_1 : i32
    scf.if %4 {
      %cst_19 = arith.constant 0.000000e+00 : f32
      %27 = vector.broadcast %cst_19 : f32 to vector<1x128xf32>
      %c0_20 = arith.constant 0 : index
      %c0_21 = arith.constant 0 : index
      %28 = vector.load %arg8[%c0_20, %c0_21] : memref<1x128xf32, #tpu.memory_space<vmem>>, vector<1x128xf32>
      tpu.vector_store %arg8[%c0_20, %c0_21], %27 {strides = array<i32>} : memref<1x128xf32, #tpu.memory_space<vmem>>, vector<1x128xf32>,
    } else {
    }
    %c0_i32_2 = arith.constant 0 : i32
    %5 = arith.cmpi eq, %arg1, %c0_i32_2 : i32
    %6 = arith.extui %5 : i1 to i32
    %c0_i32_3 = arith.constant 0 : i32
    %7 = arith.cmpi ne, %6, %c0_i32_3 : i32
    scf.if %7 {
      %cst_19 = arith.constant 0.000000e+00 : f32
      %27 = vector.broadcast %cst_19 : f32 to vector<128x128xf32>
      %c0_20 = arith.constant 0 : index
      %c0_21 = arith.constant 0 : index
      %28 = vector.load %arg9[%c0_20, %c0_21] : memref<128x128xf32, #tpu.memory_space<vmem>>, vector<128x128xf32>
      tpu.vector_store %arg9[%c0_20, %c0_21], %27 {strides = array<i32>} : memref<128x128xf32, #tpu.memory_space<vmem>>, vector<128x128xf32>,
      %cst_22 = arith.constant 0.000000e+00 : f32
      %29 = vector.broadcast %cst_22 : f32 to vector<128x1xf32>
      %c0_23 = arith.constant 0 : index
      %c0_24 = arith.constant 0 : index
      %30 = vector.load %arg10[%c0_23, %c0_24] : memref<128x1xf32, #tpu.memory_space<vmem>>, vector<128x1xf32>
      tpu.vector_store %arg10[%c0_23, %c0_24], %29 {strides = array<i32>} : memref<128x1xf32, #tpu.memory_space<vmem>>, vector<128x1xf32>,
    } else {
    }
    %c0 = arith.constant 0 : index
    %c0_4 = arith.constant 0 : index
    %8 = vector.load %arg2[%c0, %c0_4] : memref<128x128xf32, #tpu.memory_space<vmem>>, vector<128x128xf32>
    %cst = arith.constant 0.000000e+00 : f32
    %cst_5 = arith.constant 1.000000e+00 : f32
    %9 = vector.broadcast %cst : f32 to vector<128x128xf32>
    %10 = arith.maximumf %9, %8 : vector<128x128xf32>
    %11 = vector.broadcast %cst_5 : f32 to vector<128x128xf32>
    %12 = arith.minimumf %11, %10 : vector<128x128xf32>
    %c0_6 = arith.constant 0 : index
    %c0_7 = arith.constant 0 : index
    %13 = vector.load %arg10[%c0_6, %c0_7] : memref<128x1xf32, #tpu.memory_space<vmem>>, vector<128x1xf32>
    %cst_8 = arith.constant dense<0.000000e+00> : vector<128xf32>
    %14 = vector.multi_reduction <add>, %12, %cst_8 [1] : vector<128x128xf32> to vector<128xf32>
    %15 = vector.shape_cast %14 : vector<128xf32> to vector<128x1xf32>
    %16 = arith.addf %13, %15 : vector<128x1xf32>
    %c0_9 = arith.constant 0 : index
    %c0_10 = arith.constant 0 : index
    %17 = vector.load %arg10[%c0_9, %c0_10] : memref<128x1xf32, #tpu.memory_space<vmem>>, vector<128x1xf32>
    tpu.vector_store %arg10[%c0_9, %c0_10], %16 {strides = array<i32>} : memref<128x1xf32, #tpu.memory_space<vmem>>, vector<128x1xf32>,
    %c0_11 = arith.constant 0 : index
    %c0_12 = arith.constant 0 : index
    %18 = vector.load %arg9[%c0_11, %c0_12] : memref<128x128xf32, #tpu.memory_space<vmem>>, vector<128x128xf32>
    %19 = arith.truncf %12 : vector<128x128xf32> to vector<128x128xbf16>
    %c0_13 = arith.constant 0 : index
    %c0_14 = arith.constant 0 : index
    %20 = vector.load %arg3[%c0_13, %c0_14] : memref<128x128xbf16, #tpu.memory_space<vmem>>, vector<128x128xbf16>
    %cst_15 = arith.constant dense<0.000000e+00> : vector<128x128xf32>
    %21 = tpu.matmul %19, %20, %cst_15 {dimension_numbers = #tpu.dot_dimension_numbers<[1], [0], [0], [1], [0, 0, 1, 1], [], []>} : vector<128x128xbf16>, vector<128x128xbf16>, vector<128x128xf32> -> vector<128x128xf32>
    %22 = arith.addf %18, %21 : vector<128x128xf32>
    %c0_16 = arith.constant 0 : index
    %c0_17 = arith.constant 0 : index
    %23 = vector.load %arg9[%c0_16, %c0_17] : memref<128x128xf32, #tpu.memory_space<vmem>>, vector<128x128xf32>
    tpu.vector_store %arg9[%c0_16, %c0_17], %22 {strides = array<i32>} : memref<128x128xf32, #tpu.memory_space<vmem>>, vector<128x128xf32>,
    %c1_i32 = arith.constant 1 : i32
    %24 = arith.cmpi eq, %arg1, %c1_i32 : i32
    %25 = arith.extui %24 : i1 to i32
    %c0_i32_18 = arith.constant 0 : i32
    %26 = arith.cmpi ne, %25, %c0_i32_18 : i32
    scf.if %26 {
      %c0_19 = arith.constant 0 : index
      %c0_20 = arith.constant 0 : index
      %27 = vector.load %arg10[%c0_19, %c0_20] : memref<128x1xf32, #tpu.memory_space<vmem>>, vector<128x1xf32>
      %cst_21 = arith.constant 9.99999993E-9 : f32
      %28 = vector.broadcast %cst_21 : f32 to vector<128x1xf32>
      %29 = arith.addf %27, %28 : vector<128x1xf32>
      %30 = tpu.reciprocal %29 {approx = true} : vector<128x1xf32> -> vector<128x1xf32>
      %c0_22 = arith.constant 0 : index
      %c0_23 = arith.constant 0 : index
      %31 = vector.load %arg4[%c0_22, %c0_23] : memref<128x128xf32, #tpu.memory_space<vmem>>, vector<128x128xf32>
      %c0_24 = arith.constant 0 : index
      %c0_25 = arith.constant 0 : index
      %32 = vector.load %arg9[%c0_24, %c0_25] : memref<128x128xf32, #tpu.memory_space<vmem>>, vector<128x128xf32>
      %33 = vector.broadcast %30 : vector<128x1xf32> to vector<128x128xf32>
      %34 = arith.mulf %32, %33 : vector<128x128xf32>
      %35 = arith.addf %31, %34 : vector<128x128xf32>
      %36 = arith.truncf %35 : vector<128x128xf32> to vector<128x128xbf16>
      %c0_26 = arith.constant 0 : index
      %c0_27 = arith.constant 0 : index
      %37 = vector.load %arg5[%c0_26, %c0_27] : memref<128x128xbf16, #tpu.memory_space<vmem>>, vector<128x128xbf16>
      %cst_28 = arith.constant dense<0.000000e+00> : vector<128x128xf32>
      %38 = tpu.matmul %36, %37, %cst_28 {dimension_numbers = #tpu.dot_dimension_numbers<[1], [0], [0], [1], [0, 0, 1, 1], [], []>} : vector<128x128xbf16>, vector<128x128xbf16>, vector<128x128xf32> -> vector<128x128xf32>
      %c0_29 = arith.constant 0 : index
      %c0_30 = arith.constant 0 : index
      %39 = vector.load %arg6[%c0_29, %c0_30] : memref<1x128xf32, #tpu.memory_space<vmem>>, vector<1x128xf32>
      %40 = vector.broadcast %39 : vector<1x128xf32> to vector<128x128xf32>
      %41 = arith.addf %38, %40 : vector<128x128xf32>
      %42 = math.tanh %41 : vector<128x128xf32>
      %c0_31 = arith.constant 0 : index
      %c0_32 = arith.constant 0 : index
      %43 = vector.load %arg7[%c0_31, %c0_32] : memref<128x128xf32, #tpu.memory_space<vmem>>, vector<128x128xf32>
      tpu.vector_store %arg7[%c0_31, %c0_32], %42 {strides = array<i32>} : memref<128x128xf32, #tpu.memory_space<vmem>>, vector<128x128xf32>,
      %c0_33 = arith.constant 0 : index
      %c0_34 = arith.constant 0 : index
      %44 = vector.load %arg8[%c0_33, %c0_34] : memref<1x128xf32, #tpu.memory_space<vmem>>, vector<1x128xf32>
      %cst_35 = arith.constant dense<0.000000e+00> : vector<128xf32>
      %45 = vector.multi_reduction <add>, %42, %cst_35 [0] : vector<128x128xf32> to vector<128xf32>
      %46 = vector.shape_cast %45 : vector<128xf32> to vector<1x128xf32>
      %47 = arith.addf %44, %46 : vector<1x128xf32>
      %c0_36 = arith.constant 0 : index
      %c0_37 = arith.constant 0 : index
      %48 = vector.load %arg8[%c0_36, %c0_37] : memref<1x128xf32, #tpu.memory_space<vmem>>, vector<1x128xf32>
      tpu.vector_store %arg8[%c0_36, %c0_37], %47 {strides = array<i32>} : memref<1x128xf32, #tpu.memory_space<vmem>>, vector<1x128xf32>,
    } else {
    }
    return
  }
  func.func @transform_0(%arg0: i32, %arg1: i32) -> (i32, i32) {
    %c0_i32 = arith.constant 0 : i32
    return %arg0, %arg1 : i32, i32
  }
  func.func @transform_1(%arg0: i32, %arg1: i32) -> (i32, i32) {
    %c0_i32 = arith.constant 0 : i32
    %c0_i32_0 = arith.constant 0 : i32
    return %arg1, %c0_i32 : i32, i32
  }
  func.func @transform_2(%arg0: i32, %arg1: i32) -> (i32, i32) {
    %c0_i32 = arith.constant 0 : i32
    %c0_i32_0 = arith.constant 0 : i32
    return %arg0, %c0_i32 : i32, i32
  }
  func.func @transform_3(%arg0: i32, %arg1: i32) -> (i32, i32) {
    %c0_i32 = arith.constant 0 : i32
    %c0_i32_0 = arith.constant 0 : i32
    %c0_i32_1 = arith.constant 0 : i32
    return %c0_i32, %c0_i32_0 : i32, i32
  }
  func.func @transform_4(%arg0: i32, %arg1: i32) -> (i32, i32) {
    %c0_i32 = arith.constant 0 : i32
    %c0_i32_0 = arith.constant 0 : i32
    %c0_i32_1 = arith.constant 0 : i32
    return %c0_i32, %c0_i32_0 : i32, i32
  }
  func.func @transform_5(%arg0: i32, %arg1: i32) -> (i32, i32) {
    %c0_i32 = arith.constant 0 : i32
    %c0_i32_0 = arith.constant 0 : i32
    return %arg0, %c0_i32 : i32, i32
  }
  func.func @transform_6(%arg0: i32, %arg1: i32) -> (i32, i32) {
    %c0_i32 = arith.constant 0 : i32
    %c0_i32_0 = arith.constant 0 : i32
    %c0_i32_1 = arith.constant 0 : i32
    return %c0_i32, %c0_i32_0 : i32, i32
  }
}

</mosaic_0001>

<bundles_post_ra>
// kernel: gnn_encoder.2
= control target key start
LH: loop header
LB: loop body
LE: loop exit
PB: predicated region body
PF: predicated region fallthrough
CT: control target
= control target key end

     0   :  { %s1235_s24 = smov 0   ;;  %s1390_s0 = inlined_call_operand.vmem [shape: f32[256,16], index: 0, kind: input, shape index: {}]   ;;  %s1391_s1 = inlined_call_operand.vmem [shape: f32[256,128], index: 1, kind: input, shape index: {}]   ;;  %s1392_s2 = inlined_call_operand.vmem [shape: bf16[16,128], index: 2, kind: input, shape index: {}]   ;;  %s1393_s3 = inlined_call_operand.vmem [shape: f32[1,128], index: 3, kind: input, shape index: {}]   ;;  %s1394_s4 = inlined_call_operand.vmem [shape: bf16[128,128], index: 4, kind: input, shape index: {}]   ;;  %s1395_s5 = inlined_call_operand.vmem [shape: f32[1,128], index: 5, kind: input, shape index: {}]   ;;  %s1396_s6 = inlined_call_operand.vmem [shape: f32[256,128], index: 6, kind: output, shape index: {0}]   ;;  %s1397_s7 = inlined_call_operand.vmem [shape: bf16[256,128], index: 7, kind: output, shape index: {1}]  }
   0x1 LB: > { %s950_s25 = sadd.s32 4294967295, %s1193_s24   ;;  %p954_p0 = scmp.ge.s32.totalorder %s1193_s24, 1  ;;  %s1193_s24 = sphi %s1235_s24, %s18_s24  }
   0x2   : > { %p252_p1 = scmp.lt.s32.totalorder %s1193_s24, 3 }
   0x4   : > { %p253_p2 = pnand %p954_p0, %p252_p1 }
   0x5   : > { %v1178_v0 = vld [vmem:[%s1392_s2] sm:$0xff] (!%p253_p2)   ;;  %s955_s28 = sshll.u32 (!%p253_p2), %s950_s25, 4  ;;  %v1180_v2 = vld [vmem:[%s1394_s4 + $0x8] sm:$0xff] (!%p253_p2)   ;;  %v1181_v3 = vld [vmem:[%s1394_s4 + $0x10] sm:$0xff] (!%p253_p2)   ;;  %vm390_vm0 = vcmask (!%p253_p2), 130048  }
   0x6   : > { %256 = sbr.rel (%p253_p2) target bundleno = 492 (0x1ec), region = 44  ;;  %p295_p3 = scmp.lt.s32.totalorder (!%p253_p2), %s955_s28, 31  ;;  %1104 = vmatprep.subr.bf16.mxu0 (!%p253_p2), %v1178_v0  ;;  %v1179_v1 = vld [vmem:[%s1394_s4] sm:$0xff] (!%p253_p2)   ;;  %v1182_v23 = vld [vmem:[%s1394_s4 + $0x18] sm:$0xff] (!%p253_p2)   ;;  %v1184_v46 = vld [vmem:[%s1394_s4 + $0x28] sm:$0xff] (!%p253_p2)  }
   0x7   : > { %1105 = vmatpush3.bf16.msra.mxu0 (!%p253_p2), %v1178_v0  ;;  %1154 = vmatprep.subr.bf16.mxu1 (!%p253_p2), %v1179_v1  ;;  %v1183_v28 = vld [vmem:[%s1394_s4 + $0x20] sm:$0xff] (!%p253_p2)   ;;  %v1185_v47 = vld [vmem:[%s1394_s4 + $0x30] sm:$0xff] (!%p253_p2)   ;;  %v1186_v48 = vld [vmem:[%s1394_s4 + $0x38] sm:$0xff] (!%p253_p2)  }
   0x8   : > { %1122 = vmatprep.subr.bf16.mxu0 (!%p253_p2), %v1179_v1  ;;  %1162 = vmatpush3.bf16.msra.mxu1 (!%p253_p2), %v1179_v1  ;;  %v1308_v49 = vld [vmem:[%s1393_s3] ss:$0 sm:$0xff] (!%p253_p2) }
   0x9   : > { %1155 = vmatprep.subr.bf16.mxu1 (!%p253_p2), %v1180_v2 }
   0xc   : > { %1163 = vmatpush3.bf16.msra.mxu1 (!%p253_p2), %v1180_v2 }
   0xd   : > { %s1399_s28 = smov (!%p295_p3, %s955_s28), 31  ;;  %1156 = vmatprep.subr.bf16.mxu1 %v1181_v3 }
   0xe   : > { %s1255_s10 = sshll.u32 %s1399_s28, 3  ;;  %s962_s15 = sshll.u32 %s1399_s28, 2 }
   0xf   : > { %s1261_s13 = scalar_lea.vmem %s1390_s0, %s1255_s10  ;;  %s1314_s9 = scalar_lea.vmem %s1391_s1, %s1255_s10 }
  0x10   : > { %v319_v4 = vld [vmem:[%s1261_s13] sm:$0xff]  ;;  %v320_v5 = vld [vmem:[%s1261_s13 + $0x8] sm:$0xff]  ;;  %v321_v6 = vld [vmem:[%s1261_s13 + $0x10] sm:$0xff]  ;;  %1164 = vmatpush3.bf16.msra.mxu1 %v1181_v3  ;;  %s1377_s18 = scalar_lea.vmem %s1397_s7, %s962_s15 }
  0x11   : > { %v963_v7 = vclamps-f32 %v319_v4, 10.0  ;;  %v964_v8 = vclamps-f32 %v320_v5, 10.0  ;;  %v322_v9 = vld [vmem:[%s1261_s13 + $0x18] sm:$0xff]  ;;  %v965_v10 = vclamps-f32 %v321_v6, 10.0  ;;  %v323_v11 = vld [vmem:[%s1261_s13 + $0x20] sm:$0xff]  ;;  %v324_v12 = vld [vmem:[%s1261_s13 + $0x28] sm:$0xff]  ;;  %1157 = vmatprep.subr.bf16.mxu1 %v1182_v23 }
  0x12   : > { %v966_v13 = vclamps-f32 %v322_v9, 10.0  ;;  %v967_v14 = vclamps-f32 %v323_v11, 10.0  ;;  %v968_v15 = vclamps-f32 %v324_v12, 10.0  ;;  %v325_v17 = vld [vmem:[%s1261_s13 + $0x30] sm:$0xff]  ;;  %v326_v18 = vld [vmem:[%s1261_s13 + $0x38] sm:$0xff]  ;;  %v327_v21 = vld [vmem:[%s1261_s13 + $0x40] sm:$0xff] }
  0x13   : > { %v367_v16 = vpack.c.bf16 %v964_v8, %v963_v7  ;;  %v328_v22 = vld [vmem:[%s1261_s13 + $0x48] sm:$0xff]  ;;  %v969_v24 = vclamps-f32 %v325_v17, 10.0  ;;  %v970_v25 = vclamps-f32 %v326_v18, 10.0  ;;  %v971_v26 = vclamps-f32 %v327_v21, 10.0  ;;  %v329_v31 = vld [vmem:[%s1261_s13 + $0x50] sm:$0xff]  ;;  %v330_v32 = vld [vmem:[%s1261_s13 + $0x58] sm:$0xff] }
  0x14   : > { %v368_v19 = vpack.c.bf16 %v966_v13, %v965_v10  ;;  %v369_v20 = vpack.c.bf16 %v968_v15, %v967_v14  ;;  %v972_v27 = vclamps-f32 %v328_v22, 10.0  ;;  %1165 = vmatpush3.bf16.msra.mxu1 %v1182_v23  ;;  %v331_v33 = vld [vmem:[%s1261_s13 + $0x60] sm:$0xff]  ;;  %v332_v34 = vld [vmem:[%s1261_s13 + $0x68] sm:$0xff]  ;;  %v973_v35 = vclamps-f32 %v329_v31, 10.0  ;;  %v333_v41 = vld [vmem:[%s1261_s13 + $0x70] sm:$0xff] }
  0x15   : > { %1106 = vmatprep.mubr.msk.bf16.mxu0 %vm390_vm0, %v367_v16  ;;  %v370_v29 = vpack.c.bf16 %v970_v25, %v969_v24  ;;  %1158 = vmatprep.subr.bf16.mxu1 %v1183_v28  ;;  %v974_v36 = vclamps-f32 %v330_v32, 10.0  ;;  %v975_v37 = vclamps-f32 %v331_v33, 10.0  ;;  %v976_v38 = vclamps-f32 %v332_v34, 10.0  ;;  %v334_v42 = vld [vmem:[%s1261_s13 + $0x78] sm:$0xff]  ;;  %v530_v53 = vld [vmem:[%s1314_s9 + $0x10] sm:$0xff]  ;;  %v528_v57 = vld [vmem:[%s1314_s9] sm:$0xff]  ;;  %s1325_s13 = scalar_lea.vmem %s1396_s6, %s1255_s10 }
  0x16   : > { %1107 = vmatmul.mubr.msk.bf16.vlgmr.msra.gmra.mrb[0].mxu0 %vm390_vm0, %v368_v19  ;;  %v371_v30 = vpack.c.bf16 %v972_v27, %v971_v26  ;;  %v977_v43 = vclamps-f32 %v333_v41, 10.0  ;;  %v978_v44 = vclamps-f32 %v334_v42, 10.0  ;;  %v531_v61 = vld [vmem:[%s1314_s9 + $0x18] sm:$0xff]  ;;  %v534_v10 = vld [vmem:[%s1314_s9 + $0x30] sm:$0xff]  ;;  %v532_v17 = vld [vmem:[%s1314_s9 + $0x20] sm:$0xff] }
  0x17   : > { %1110 = vmatprep.mubr.msk.bf16.mxu0 %vm390_vm0, %v369_v20  ;;  %1123 = vmatpush3.bf16.msra.mxu0 %v1179_v1  ;;  %v372_v39 = vpack.c.bf16 %v974_v36, %v973_v35  ;;  %v373_v40 = vpack.c.bf16 %v976_v38, %v975_v37  ;;  %v529_v1 = vld [vmem:[%s1314_s9 + $0x8] sm:$0xff]  ;;  %v535_v19 = vld [vmem:[%s1314_s9 + $0x38] sm:$0xff]  ;;  %v538_v32 = vld [vmem:[%s1314_s9 + $0x50] sm:$0xff] }
  0x18   : > { %1124 = vmatprep.subr.bf16.mxu0 %v1180_v2  ;;  %1166 = vmatpush3.bf16.msra.mxu1 %v1183_v28  ;;  %v374_v45 = vpack.c.bf16 %v978_v44, %v977_v43  ;;  %v536_v37 = vld [vmem:[%s1314_s9 + $0x40] sm:$0xff]  ;;  %v539_v41 = vld [vmem:[%s1314_s9 + $0x58] sm:$0xff] }
  0x19   : > { %1159 = vmatprep.subr.bf16.mxu1 %v1184_v46 }
  0x1b   : > { %1125 = vmatpush3.bf16.msra.mxu0 %v1180_v2 }
  0x1c   : > { %1126 = vmatprep.subr.bf16.mxu0 %v1181_v3  ;;  %1167 = vmatpush3.bf16.msra.mxu1 %v1184_v46 }
  0x1d   : > { %1160 = vmatprep.subr.bf16.mxu1 %v1185_v47 }
  0x1e   : > { %1111 = vmatmul.mubr.msk.bf16.gmra.mrb[4].mxu0 %vm390_vm0, %v370_v29 }
  0x1f   : > { %1114 = vmatprep.mubr.msk.bf16.mxu0 %vm390_vm0, %v371_v30  ;;  %1127 = vmatpush3.bf16.msra.mxu0 %v1181_v3 }
  0x20   : > { %1128 = vmatprep.subr.bf16.mxu0 %v1182_v23  ;;  %1168 = vmatpush3.bf16.msra.mxu1 %v1185_v47 }
  0x21   : > { %1161 = vmatprep.subr.bf16.mxu1 %v1186_v48 }
  0x23   : > { %1129 = vmatpush3.bf16.msra.mxu0 %v1182_v23  ;;  %v533_v23 = vld [vmem:[%s1314_s9 + $0x28] sm:$0xff] }
  0x24   : > { %1130 = vmatprep.subr.bf16.mxu0 %v1183_v28  ;;  %1169 = vmatpush3.bf16.msra.mxu1 %v1186_v48 }
  0x26   : > { %1115 = vmatmul.mubr.msk.bf16.gmra.mrb[8].mxu0 %vm390_vm0, %v372_v39 }
  0x27   : > { %1118 = vmatprep.mubr.msk.bf16.mxu0 %vm390_vm0, %v373_v40  ;;  %1131 = vmatpush3.bf16.msra.mxu0 %v1183_v28 }
  0x28   : > { %1132 = vmatprep.subr.bf16.mxu0 %v1184_v46 }
  0x2b   : > { %1133 = vmatpush3.bf16.msra.mxu0 %v1184_v46 }
  0x2c   : > { %1134 = vmatprep.subr.bf16.mxu0 %v1185_v47 }
  0x2e   : > { %1119 = vmatmul.mubr.msk.bf16.gmra.mrb[12].mxu0 %vm390_vm0, %v374_v45  ;;  %v537_v45 = vld [vmem:[%s1314_s9 + $0x48] sm:$0xff] }
  0x2f   : > { %1135 = vmatpush3.bf16.msra.mxu0 %v1185_v47 }
  0x30   : > { %1136 = vmatprep.subr.bf16.mxu0 %v1186_v48 }
  0x33   : > { %1137 = vmatpush3.bf16.msra.mxu0 %v1186_v48 }
  0xe9   : > { %v1108_v50 = vpop.f32.mrb[0].mxu0 }
  0xea   : > { %v458_v51 = vadd.f32 %v1108_v50, %v1308_v49  ;;  %v449_v52 = vpop.f32.mrb[1].mxu0 }
  0xeb   : > { %v450_v54 = vadd.f32 %v1308_v49, %v449_v52  ;;  %v1109_v55 = vpop.f32.mrb[2].mxu0 }
  0xec   : > { %v514_v56 = vmax.f32 %v458_v51, 0.0  ;;  %v461_v58 = vadd.f32 %v1109_v55, %v1308_v49  ;;  %v452_v59 = vpop.f32.mrb[3].mxu0  ;;  %v542_v55 = vld [vmem:[%s1314_s9 + $0x70] sm:$0xff] }
  0xed   : > { %v512_v60 = vmax.f32 %v450_v54, 0.0  ;;  %v453_v62 = vadd.f32 %v1308_v49, %v452_v59 }
  0xee   : > { %v546_v63 = vadd.f32 %v530_v53, %v514_v56  ;;  %v515_v0 = vmax.f32 %v461_v58, 0.0 }
  0xef   : > { %v544_v2 = vadd.f32 %v528_v57, %v512_v60  ;;  %v513_v3 = vmax.f32 %v453_v62, 0.0  ;;  %v540_v60 = vld [vmem:[%s1314_s9 + $0x60] sm:$0xff] }
  0xf0   : > { %754 = vst [vmem:[%s1325_s13 + $0x10] sm:$0xff] %v546_v63  ;;  %v547_v4 = vadd.f32 %v531_v61, %v515_v0  ;;  %v543_v0 = vld [vmem:[%s1314_s9 + $0x78] sm:$0xff] }
  0xf1   : > { %752 = vst [vmem:[%s1325_s13] sm:$0xff] %v544_v2  ;;  %v545_v5 = vadd.f32 %v529_v1, %v513_v3  ;;  %v1112_v6 = vpop.f32.mrb[4].mxu0 }
  0xf2   : > { %v561_v7 = vpack.c.bf16 %v547_v4, %v546_v63  ;;  %755 = vst [vmem:[%s1325_s13 + $0x18] sm:$0xff] %v547_v4  ;;  %v474_v8 = vadd.f32 %v1112_v6, %v1308_v49  ;;  %v465_v9 = vpop.f32.mrb[5].mxu0  ;;  %v541_v4 = vld [vmem:[%s1314_s9 + $0x68] sm:$0xff] }
  0xf3   : > { %753 = vst [vmem:[%s1325_s13 + $0x8] sm:$0xff] %v545_v5  ;;  %v466_v11 = vadd.f32 %v1308_v49, %v465_v9  ;;  %v1113_v12 = vpop.f32.mrb[6].mxu0  ;;  %v560_v13 = vpack.c.bf16 %v545_v5, %v544_v2 }
  0xf4   : > { %v518_v14 = vmax.f32 %v474_v8, 0.0  ;;  %v477_v15 = vadd.f32 %v1113_v12, %v1308_v49  ;;  %v468_v16 = vpop.f32.mrb[7].mxu0 }
  0xf5   : > { %v516_v18 = vmax.f32 %v466_v11, 0.0  ;;  %v469_v20 = vadd.f32 %v1308_v49, %v468_v16  ;;  %1138 = vmatprep.mubr.bf16.mxu0 %v560_v13 }
  0xf6   : > { %v550_v21 = vadd.f32 %v534_v10, %v518_v14  ;;  %v519_v22 = vmax.f32 %v477_v15, 0.0  ;;  %1139 = vmatmul.mubr.bf16.vlgmr.msra.gmra.mrb[16].mxu0 %v561_v7 }
  0xf7   : > { %v517_v24 = vmax.f32 %v469_v20, 0.0  ;;  %v548_v25 = vadd.f32 %v532_v17, %v516_v18 }
  0xf8   : > { %758 = vst [vmem:[%s1325_s13 + $0x30] sm:$0xff] %v550_v21  ;;  %v551_v26 = vadd.f32 %v535_v19, %v519_v22 }
  0xf9   : > { %v1116_v27 = vpop.f32.mrb[8].mxu0  ;;  %v549_v28 = vadd.f32 %v533_v23, %v517_v24  ;;  %756 = vst [vmem:[%s1325_s13 + $0x20] sm:$0xff] %v548_v25 }
  0xfa   : > { %759 = vst [vmem:[%s1325_s13 + $0x38] sm:$0xff] %v551_v26  ;;  %v490_v29 = vadd.f32 %v1116_v27, %v1308_v49  ;;  %v481_v30 = vpop.f32.mrb[9].mxu0  ;;  %v563_v31 = vpack.c.bf16 %v551_v26, %v550_v21 }
  0xfb   : > { %v482_v33 = vadd.f32 %v1308_v49, %v481_v30  ;;  %v1117_v34 = vpop.f32.mrb[10].mxu0  ;;  %v562_v35 = vpack.c.bf16 %v549_v28, %v548_v25  ;;  %757 = vst [vmem:[%s1325_s13 + $0x28] sm:$0xff] %v549_v28 }
  0xfc   : > { %v522_v36 = vmax.f32 %v490_v29, 0.0  ;;  %v493_v38 = vadd.f32 %v1117_v34, %v1308_v49  ;;  %v484_v39 = vpop.f32.mrb[11].mxu0 }
  0xfd   : > { %v520_v40 = vmax.f32 %v482_v33, 0.0  ;;  %v485_v42 = vadd.f32 %v1308_v49, %v484_v39  ;;  %1142 = vmatprep.mubr.bf16.mxu1 %v562_v35 }
  0xfe   : > { %v554_v43 = vadd.f32 %v538_v32, %v522_v36  ;;  %v523_v44 = vmax.f32 %v493_v38, 0.0  ;;  %1143 = vmatmul.mubr.bf16.vlgmr.msra.gmra.mrb[0].mxu1 %v563_v31 }
  0xff   : > { %v552_v46 = vadd.f32 %v536_v37, %v520_v40  ;;  %v521_v47 = vmax.f32 %v485_v42, 0.0 }
 0x100   : > { %762 = vst [vmem:[%s1325_s13 + $0x50] sm:$0xff] %v554_v43  ;;  %v555_v48 = vadd.f32 %v539_v41, %v523_v44 }
 0x101   : > { %760 = vst [vmem:[%s1325_s13 + $0x40] sm:$0xff] %v552_v46  ;;  %v553_v50 = vadd.f32 %v537_v45, %v521_v47  ;;  %v1120_v51 = vpop.f32.mrb[12].mxu0 }
 0x102   : > { %763 = vst [vmem:[%s1325_s13 + $0x58] sm:$0xff] %v555_v48  ;;  %v506_v52 = vadd.f32 %v1120_v51, %v1308_v49  ;;  %v497_v53 = vpop.f32.mrb[13].mxu0  ;;  %v565_v54 = vpack.c.bf16 %v555_v48, %v554_v43 }
 0x103   : > { %761 = vst [vmem:[%s1325_s13 + $0x48] sm:$0xff] %v553_v50  ;;  %v498_v56 = vadd.f32 %v1308_v49, %v497_v53  ;;  %v1121_v57 = vpop.f32.mrb[14].mxu0  ;;  %v564_v58 = vpack.c.bf16 %v553_v50, %v552_v46 }
 0x104   : > { %v526_v59 = vmax.f32 %v506_v52, 0.0  ;;  %v509_v61 = vadd.f32 %v1121_v57, %v1308_v49  ;;  %v500_v62 = vpop.f32.mrb[15].mxu0 }
 0x105   : > { %v524_v63 = vmax.f32 %v498_v56, 0.0  ;;  %v501_v1 = vadd.f32 %v1308_v49, %v500_v62  ;;  %1146 = vmatprep.mubr.bf16.mxu1 %v564_v58  ;;  %v989_v49 = vld [vmem:[%s1395_s5] ss:$0 sm:$0xff] }
 0x106   : > { %v558_v2 = vadd.f32 %v542_v55, %v526_v59  ;;  %v527_v3 = vmax.f32 %v509_v61, 0.0  ;;  %1147 = vmatmul.mubr.bf16.gmra.mrb[4].mxu1 %v565_v54 }
 0x107   : > { %v556_v5 = vadd.f32 %v540_v60, %v524_v63  ;;  %v525_v6 = vmax.f32 %v501_v1, 0.0 }
 0x108   : > { %766 = vst [vmem:[%s1325_s13 + $0x70] sm:$0xff] %v558_v2  ;;  %v559_v7 = vadd.f32 %v543_v0, %v527_v3 }
 0x109   : > { %764 = vst [vmem:[%s1325_s13 + $0x60] sm:$0xff] %v556_v5  ;;  %v557_v8 = vadd.f32 %v541_v4, %v525_v6 }
 0x10a   : > { %767 = vst [vmem:[%s1325_s13 + $0x78] sm:$0xff] %v559_v7  ;;  %v567_v9 = vpack.c.bf16 %v559_v7, %v558_v2 }
 0x10b   : > { %765 = vst [vmem:[%s1325_s13 + $0x68] sm:$0xff] %v557_v8  ;;  %v566_v10 = vpack.c.bf16 %v557_v8, %v556_v5 }
 0x10d   : > { %1150 = vmatprep.mubr.bf16.mxu1 %v566_v10 }
 0x10e   : > { %1151 = vmatmul.mubr.bf16.gmra.mrb[8].mxu1 %v567_v9 }
 0x1c9   : > { %v1140_v11 = vpop.f32.mrb[16].mxu0 }
 0x1ca   : > { %v682_v12 = vadd.f32 %v1140_v11, %v989_v49  ;;  %v673_v13 = vpop.f32.mrb[17].mxu0 }
 0x1cb   : > { %v674_v14 = vadd.f32 %v989_v49, %v673_v13  ;;  %v1141_v15 = vpop.f32.mrb[18].mxu0 }
 0x1cc   : > { %v685_v16 = vadd.f32 %v1141_v15, %v989_v49  ;;  %v676_v17 = vpop.f32.mrb[19].mxu0  ;;  %v738_v19 = vmax.f32 %v682_v12, 0.0 }
 0x1cd   : > { %v677_v18 = vadd.f32 %v989_v49, %v676_v17  ;;  %v736_v21 = vmax.f32 %v674_v14, 0.0 }
 0x1ce   : > { %v739_v20 = vmax.f32 %v685_v16, 0.0 }
 0x1cf   : > { %v737_v22 = vmax.f32 %v677_v18, 0.0 }
 0x1d0   : > { %v1040_v23 = vpack.c.bf16 %v739_v20, %v738_v19 }
 0x1d1   : > { %v1035_v24 = vpack.c.bf16 %v737_v22, %v736_v21  ;;  %v1144_v25 = vpop.f32.mrb[0].mxu1 }
 0x1d2   : > { %1072 = vst [vmem:[%s1377_s18 + $0x8] sm:$0xff] %v1040_v23   ;;  %v698_v26 = vadd.f32 %v1144_v25, %v989_v49  ;;  %v689_v27 = vpop.f32.mrb[1].mxu1 }
 0x1d3   : > { %1036 = vst [vmem:[%s1377_s18] sm:$0xff] %v1035_v24   ;;  %v690_v28 = vadd.f32 %v989_v49, %v689_v27  ;;  %v1145_v29 = vpop.f32.mrb[2].mxu1 }
 0x1d4   : > { %v701_v30 = vadd.f32 %v1145_v29, %v989_v49  ;;  %v692_v31 = vpop.f32.mrb[3].mxu1  ;;  %v742_v33 = vmax.f32 %v698_v26, 0.0 }
 0x1d5   : > { %v693_v32 = vadd.f32 %v989_v49, %v692_v31  ;;  %v740_v35 = vmax.f32 %v690_v28, 0.0 }
 0x1d6   : > { %v743_v34 = vmax.f32 %v701_v30, 0.0 }
 0x1d7   : > { %v741_v36 = vmax.f32 %v693_v32, 0.0 }
 0x1d8   : > { %v1050_v37 = vpack.c.bf16 %v743_v34, %v742_v33 }
 0x1d9   : > { %v1045_v38 = vpack.c.bf16 %v741_v36, %v740_v35  ;;  %v1148_v39 = vpop.f32.mrb[4].mxu1 }
 0x1da   : > { %1074 = vst [vmem:[%s1377_s18 + $0x18] sm:$0xff] %v1050_v37   ;;  %v714_v40 = vadd.f32 %v1148_v39, %v989_v49  ;;  %v705_v41 = vpop.f32.mrb[5].mxu1 }
 0x1db   : > { %1073 = vst [vmem:[%s1377_s18 + $0x10] sm:$0xff] %v1045_v38   ;;  %v706_v42 = vadd.f32 %v989_v49, %v705_v41  ;;  %v1149_v43 = vpop.f32.mrb[6].mxu1 }
 0x1dc   : > { %v717_v44 = vadd.f32 %v1149_v43, %v989_v49  ;;  %v708_v45 = vpop.f32.mrb[7].mxu1  ;;  %v746_v47 = vmax.f32 %v714_v40, 0.0 }
 0x1dd   : > { %v709_v46 = vadd.f32 %v989_v49, %v708_v45  ;;  %v744_v50 = vmax.f32 %v706_v42, 0.0 }
 0x1de   : > { %v747_v48 = vmax.f32 %v717_v44, 0.0 }
 0x1df   : > { %v745_v51 = vmax.f32 %v709_v46, 0.0 }
 0x1e0   : > { %v1060_v52 = vpack.c.bf16 %v747_v48, %v746_v47 }
 0x1e1   : > { %v1055_v53 = vpack.c.bf16 %v745_v51, %v744_v50  ;;  %v1152_v54 = vpop.f32.mrb[8].mxu1 }
 0x1e2   : > { %1076 = vst [vmem:[%s1377_s18 + $0x28] sm:$0xff] %v1060_v52   ;;  %v730_v55 = vadd.f32 %v1152_v54, %v989_v49  ;;  %v721_v56 = vpop.f32.mrb[9].mxu1 }
 0x1e3   : > { %1075 = vst [vmem:[%s1377_s18 + $0x20] sm:$0xff] %v1055_v53   ;;  %v722_v57 = vadd.f32 %v989_v49, %v721_v56  ;;  %v1153_v58 = vpop.f32.mrb[10].mxu1 }
 0x1e4   : > { %v733_v59 = vadd.f32 %v1153_v58, %v989_v49  ;;  %v724_v60 = vpop.f32.mrb[11].mxu1  ;;  %v750_v62 = vmax.f32 %v730_v55, 0.0 }
 0x1e5   : > { %v725_v61 = vadd.f32 %v989_v49, %v724_v60  ;;  %v748_v0 = vmax.f32 %v722_v57, 0.0 }
 0x1e6   : > { %v751_v63 = vmax.f32 %v733_v59, 0.0 }
 0x1e7   : > { %v749_v1 = vmax.f32 %v725_v61, 0.0 }
 0x1e8   : > { %v1070_v2 = vpack.c.bf16 %v751_v63, %v750_v62 }
 0x1e9   : > { %v1065_v3 = vpack.c.bf16 %v749_v1, %v748_v0 }
 0x1ea   : > { %1078 = vst [vmem:[%s1377_s18 + $0x38] sm:$0xff] %v1070_v2  }
 0x1eb   : > { %1077 = vst [vmem:[%s1377_s18 + $0x30] sm:$0xff] %v1065_v3  }
 0x1ec PF: > { %s18_s24 = sadd.s32 1, %s1193_s24  }
 0x1ed   : > { %p15_p4 = scmp.ge.s32.totalorder %s18_s24, 4  }
 0x1ef   :  { %17 = sbr.rel (!%p15_p4) target bundleno = 1 (0x1), region = 89 }

// kernel: gnn_encoder.3
= control target key start
LH: loop header
LB: loop body
LE: loop exit
PB: predicated region body
PF: predicated region fallthrough
CT: control target
= control target key end

     0   :  { %s2210_s0 = inlined_call_operand.vmem [shape: f32[256,256], index: 0, kind: input, shape index: {}]   ;;  %s2211_s1 = inlined_call_operand.vmem [shape: bf16[256,128], index: 1, kind: input, shape index: {}]   ;;  %s2212_s2 = inlined_call_operand.vmem [shape: f32[256,128], index: 2, kind: input, shape index: {}]   ;;  %s2213_s3 = inlined_call_operand.vmem [shape: bf16[128,128], index: 3, kind: input, shape index: {}]   ;;  %s2214_s4 = inlined_call_operand.vmem [shape: f32[1,128], index: 4, kind: input, shape index: {}]   ;;  %s2215_s5 = inlined_call_operand.hbm [shape: f32[256,128], index: 5, kind: output, shape index: {0}]   ;;  %s2216_s6 = inlined_call_operand.vmem [shape: f32[1,128], index: 6, kind: output, shape index: {1}]  }
   0x1   :  { %2222 = sst [smem:[#allocation13_spill]] %s2210_s0 }
   0x2   :  { %12 = vsyncpa [#allocation6], 0 }
   0x3   :  { %14 = vsyncpa [#allocation6 + $0x1], 0  ;;  %s1844_s21 = smov 0   ;;  %s1846_s22 = smov 0  }
   0x4   :  { %s1848_s23 = smov 0   ;;  %s1850_s24 = smov 0  }
   0x5   :  { %s1852_s25 = smov 0   ;;  %s1854_s26 = smov 0  }
   0x6   :  { %s1856_s27 = smov 0   ;;  %s1858_s28 = smov 0  }
   0x7   :  { %s1860_s29 = smov 0   ;;  %s1862_s30 = smov 0  }
   0x8 LB: > { %2223 = sst [smem:[#allocation8_spill]] %s1793_s28  ;;  %s1348_s7 = sadd.s32 4294967295, %s1801_s30   ;;  %s1801_s30 = sphi %s1862_s30, %s20_s30   ;;  %s1797_s29 = sphi %s1860_s29, %s2237_s29   ;;  %s1793_s28 = sphi %s1858_s28, %s2236_s28   ;;  %s1789_s27 = sphi %s1856_s27, %s2235_s27   ;;  %s1785_s26 = sphi %s1854_s26, %s2234_s26   ;;  %s1781_s25 = sphi %s1852_s25, %s2242_s25   ;;  %s1777_s24 = sphi %s1850_s24, %s2241_s24   ;;  %s1773_s23 = sphi %s1848_s23, %s2240_s23   ;;  %s1769_s22 = sphi %s1846_s22, %s2239_s22   ;;  %s1765_s21 = sphi %s1844_s21, %s2238_s21  }
   0x9   : > { %2224 = sst [smem:[#allocation9_spill]] %s1797_s29  ;;  %s1349_s8 = sadd.s32 4294967294, %s1801_s30  }
   0xa   : > { %s29_s9 = sadd.s32 1, %s1793_s28  ;;  %s32_s10 = sadd.s32 1, %s1797_s29 }
   0xb   : > { %p30_p0 = scmp.ge.s32.totalorder %s29_s9, 2  ;;  %s41_s11 = sadd.s32 1, %s1781_s25 }
   0xc   : > { %p48_p1 = scmp.ne.s32.totalorder %s1781_s25, %s1777_s24  ;;  %p49_p2 = scmp.eq.s32.totalorder %s1801_s30, 0 }
   0xd   : > { %s2244_s9 = smov (%p30_p0, %s29_s9), 0  ;;  %s2246_s10 = smov (!%p30_p0, %s32_s10), %s1797_s29 }
   0xe   : > { %2225 = sst [smem:[#allocation10_spill]] %s2244_s9  ;;  %s37_s12 = ssub.s32 %s1793_s28, %s2244_s9 }
   0xf   : > { %p1907_p3 = por %p49_p2, %p48_p1  ;;  %p34_p4 = scmp.ge.s32.totalorder %s2246_s10, 2 }
  0x10   : > { %s161_s14 = sadd.s32 1, %s1773_s23  ;;  %p171_p5 = scmp.ne.s32.totalorder %s1773_s23, %s1769_s22 }
  0x11   : > { %p172_p6 = scmp.eq.s32.totalorder %s1348_s7, 3  ;;  %s2248_s10 = smov (%p34_p4, %s2246_s10), 0 }
  0x12   : > { %2227 = sst [smem:[#allocation11_spill]] %s2248_s10  ;;  %p177_p8 = scmp.ne.s32.totalorder %s1769_s22, %s1765_s21 }
  0x13   : > { %p1916_p7 = por %p172_p6, %p171_p5  ;;  %s36_s16 = ssub.s32 %s1797_s29, %s2248_s10 }
  0x14   : > { %p178_p9 = scmp.eq.s32.totalorder %s1349_s8, 3  ;;  %s38_s17 = sor.u32 %s37_s12, %s36_s16 }
  0x15   : > { %p159_p10 = scmp.eq.s32.totalorder %s36_s16, 0  ;;  %p39_p11 = scmp.eq.s32.totalorder %s38_s17, 0 }
  0x16   : > { %p1924_p12 = por %p178_p9, %p177_p8  ;;  %p1351_p13 = scmp.ge.s32.totalorder %s1801_s30, 4 }
  0x17   : > { %s1929_s19 = scalar_select %p159_p10, %s1773_s23, %s161_s14  }
  0x18   : > { %s1932_s20 = scalar_select %p39_p11, %s1781_s25, %s41_s11  }
  0x19   : > { %221 = sbr.rel (%p1351_p13) target bundleno = 50 (0x32), region = 24 }
  0x1a   : > { %2230 = sst [smem:[#allocation12_spill]] %s1932_s20 }
  0x20   : > { %224 = sbr.rel (!%p1907_p3) target bundleno = 50 (0x32), region = 28  ;;  %s226_s7 = sand.u32 (%p1907_p3), 1, %s1781_s25  }
  0x21   : > { %s1387_s8 = sshll.u32 (%p1907_p3), %s1797_s29, 5  ;;  %s1352_s12 = sshll.u32 (%p1907_p3), %s226_s7, 7 }
  0x22   : > { %s231_s16 = sadd.s32 (%p1907_p3), %s1793_s28, %s1387_s8  ;;  %s2231_s0 = sld [smem:[#allocation13_spill]] (%p1907_p3) }
  0x23   : > { %s1355_s17 = sshll.u32 (%p1907_p3), %s231_s16, 3  ;;  %s228_s11 = scalar_lea.vmem (%p1907_p3), [#allocation4], %s1352_s12 }
  0x28   : > { %s1943_s14 = scalar_lea.vmem %s2231_s0, %s1355_s17 }
  0x29   : > { %v291_v0 = vld [vmem:[%s1943_s14] sm:$0xff]  ;;  %v293_v1 = vld [vmem:[%s1943_s14 + $0x10] sm:$0xff] }
  0x2a   : > { %v295_v2 = vld [vmem:[%s1943_s14 + $0x20] sm:$0xff]  ;;  %292 = vst [vmem:[%s228_s11] sm:$0xff] %v291_v0  ;;  %294 = vst [vmem:[%s228_s11 + $0x8] sm:$0xff] %v293_v1  ;;  %v297_v3 = vld [vmem:[%s1943_s14 + $0x30] sm:$0xff] }
  0x2b   : > { %296 = vst [vmem:[%s228_s11 + $0x10] sm:$0xff] %v295_v2  ;;  %v299_v4 = vld [vmem:[%s1943_s14 + $0x40] sm:$0xff]  ;;  %v301_v5 = vld [vmem:[%s1943_s14 + $0x50] sm:$0xff]  ;;  %298 = vst [vmem:[%s228_s11 + $0x18] sm:$0xff] %v297_v3 }
  0x2c   : > { %300 = vst [vmem:[%s228_s11 + $0x20] sm:$0xff] %v299_v4  ;;  %302 = vst [vmem:[%s228_s11 + $0x28] sm:$0xff] %v301_v5  ;;  %v303_v6 = vld [vmem:[%s1943_s14 + $0x60] sm:$0xff]  ;;  %v305_v7 = vld [vmem:[%s1943_s14 + $0x70] sm:$0xff] }
  0x2d   : > { %v307_v8 = vld [vmem:[%s1943_s14 + $0x80] sm:$0xff]  ;;  %304 = vst [vmem:[%s228_s11 + $0x30] sm:$0xff] %v303_v6  ;;  %306 = vst [vmem:[%s228_s11 + $0x38] sm:$0xff] %v305_v7  ;;  %v309_v9 = vld [vmem:[%s1943_s14 + $0x90] sm:$0xff] }
  0x2e   : > { %308 = vst [vmem:[%s228_s11 + $0x40] sm:$0xff] %v307_v8  ;;  %v311_v10 = vld [vmem:[%s1943_s14 + $0xa0] sm:$0xff]  ;;  %v313_v11 = vld [vmem:[%s1943_s14 + $0xb0] sm:$0xff]  ;;  %310 = vst [vmem:[%s228_s11 + $0x48] sm:$0xff] %v309_v9 }
  0x2f   : > { %312 = vst [vmem:[%s228_s11 + $0x50] sm:$0xff] %v311_v10  ;;  %314 = vst [vmem:[%s228_s11 + $0x58] sm:$0xff] %v313_v11  ;;  %v315_v12 = vld [vmem:[%s1943_s14 + $0xc0] sm:$0xff]  ;;  %v317_v13 = vld [vmem:[%s1943_s14 + $0xd0] sm:$0xff] }
  0x30   : > { %v319_v14 = vld [vmem:[%s1943_s14 + $0xe0] sm:$0xff]  ;;  %316 = vst [vmem:[%s228_s11 + $0x60] sm:$0xff] %v315_v12  ;;  %318 = vst [vmem:[%s228_s11 + $0x68] sm:$0xff] %v317_v13  ;;  %v321_v15 = vld [vmem:[%s1943_s14 + $0xf0] sm:$0xff] }
  0x31   : > { %320 = vst [vmem:[%s228_s11 + $0x70] sm:$0xff] %v319_v14  ;;  %322 = vst [vmem:[%s228_s11 + $0x78] sm:$0xff] %v321_v15 }
  0x32 PF: > { %p1356_p0 = scmp.ge.s32.totalorder %s1801_s30, 1  ;;  %p345_p1 = scmp.lt.s32.totalorder %s1801_s30, 5 }
  0x34   : > { %p346_p2 = pnand %p1356_p0, %p345_p1 }
  0x35   : > { %s352_s9 = sand.u32 (!%p346_p2), 1, %s1777_s24   ;;  %s2219_s10 = sand.u32 (!%p346_p2), 1, %s1769_s22  }
  0x36   : > { %349 = sbr.rel (%p346_p2) target bundleno = 777 (0x309), region = 74  ;;  %s1357_s13 = sshll.u32 (!%p346_p2), %s352_s9, 7 }
  0x37   : > { %s1358_s7 = sshll.u32 (!%p346_p2), %s2219_s10, 7  ;;  %s1359_s8 = sshll.u32 (!%p346_p2), %s1785_s26, 4 }
  0x38   : > { %s1361_s12 = sshll.u32 (!%p346_p2), %s1789_s27, 4  ;;  %p393_p3 = scmp.lt.s32.totalorder (!%p346_p2), %s1359_s8, 31 }
  0x39   : > { %p399_p4 = scmp.lt.s32.totalorder (!%p346_p2), %s1361_s12, 31  ;;  %p406_p5 = scmp.eq.s32.totalorder (!%p346_p2), %s1789_s27, 0 }
  0x3a   : > { %p407_p6 = scmp.eq.s32.totalorder (!%p346_p2), %s1785_s26, 0  ;;  %s1981_s29 = scalar_lea.vmem (!%p346_p2), [#allocation4], %s1357_s13 }
  0x3b   : > { %s1983_s28 = scalar_lea.vmem (!%p346_p2), [#allocation5], %s1358_s7 }
  0x3c   : > { %p408_p8 = pnand (!%p346_p2), %p407_p6, %p406_p5 }
  0x3d   : > { %s2250_s8 = smov (!%p393_p3, %s1359_s8), 31  ;;  %s2252_s12 = smov (!%p399_p4, %s1361_s12), 31 }
  0x3e   : > { %s1360_s16 = sshll.u32 %s2250_s8, 2  ;;  %s1362_s24 = sshll.u32 %s2252_s12, 3  ;;  %v1803_v16 = vmov (!%p408_p8), 0.0  }
  0x3f   : > { %s1974_s11 = scalar_lea.vmem %s2211_s1, %s1360_s16  ;;  %s1979_s10 = scalar_lea.vmem %s2212_s2, %s1362_s24  ;;  %412 = vst [vmem:[%s2216_s6] sm:$0x1] (!%p408_p8), %v1803_v16 }
  0x40   : > { %411 = sbr.rel (%p408_p8) target bundleno = 71 (0x47), region = 82 }
  0x47 PF: > { %p1363_p9 = scmp.ne.s32.totalorder %s1785_s26, 0 }
  0x48   : > { %vm432_vm0 = vcmask (!%p1363_p9), 7168   ;;  %v1804_v17 = vmov (!%p1363_p9), 0.0  }
  0x49   : > { %415 = sbr.rel (%p1363_p9) target bundleno = 89 (0x59), region = 86  ;;  %416 = vst [vmem:[#allocation2] sm:$0xff] (!%p1363_p9), %v1804_v17  ;;  %417 = vst [vmem:[#allocation2 + $0x8] sm:$0xff] (!%p1363_p9), %v1804_v17 }
  0x4a   : > { %418 = vst [vmem:[#allocation2 + $0x10] sm:$0xff] (!%p1363_p9), %v1804_v17  ;;  %419 = vst [vmem:[#allocation2 + $0x18] sm:$0xff] (!%p1363_p9), %v1804_v17 }
  0x4b   : > { %420 = vst [vmem:[#allocation2 + $0x20] sm:$0xff] (!%p1363_p9), %v1804_v17  ;;  %421 = vst [vmem:[#allocation2 + $0x28] sm:$0xff] (!%p1363_p9), %v1804_v17 }
  0x4c   : > { %422 = vst [vmem:[#allocation2 + $0x30] sm:$0xff] (!%p1363_p9), %v1804_v17  ;;  %423 = vst [vmem:[#allocation2 + $0x38] sm:$0xff] (!%p1363_p9), %v1804_v17 }
  0x4d   : > { %424 = vst [vmem:[#allocation2 + $0x40] sm:$0xff] (!%p1363_p9), %v1804_v17  ;;  %425 = vst [vmem:[#allocation2 + $0x48] sm:$0xff] (!%p1363_p9), %v1804_v17 }
  0x4e   : > { %426 = vst [vmem:[#allocation2 + $0x50] sm:$0xff] (!%p1363_p9), %v1804_v17  ;;  %427 = vst [vmem:[#allocation2 + $0x58] sm:$0xff] (!%p1363_p9), %v1804_v17 }
  0x4f   : > { %428 = vst [vmem:[#allocation2 + $0x60] sm:$0xff] (!%p1363_p9), %v1804_v17  ;;  %429 = vst [vmem:[#allocation2 + $0x68] sm:$0xff] (!%p1363_p9), %v1804_v17 }
  0x50   : > { %430 = vst [vmem:[#allocation2 + $0x70] sm:$0xff] %v1804_v17  ;;  %431 = vst [vmem:[#allocation2 + $0x78] sm:$0xff] %v1804_v17 }
  0x51   : > { %433 = vst.msk [vmem:[#allocation3] sm:$0xff] %vm432_vm0, %v1804_v17  ;;  %434 = vst.msk [vmem:[#allocation3 + $0x8] sm:$0xff] %vm432_vm0, %v1804_v17 }
  0x52   : > { %435 = vst.msk [vmem:[#allocation3 + $0x10] sm:$0xff] %vm432_vm0, %v1804_v17  ;;  %436 = vst.msk [vmem:[#allocation3 + $0x18] sm:$0xff] %vm432_vm0, %v1804_v17 }
  0x53   : > { %437 = vst.msk [vmem:[#allocation3 + $0x20] sm:$0xff] %vm432_vm0, %v1804_v17  ;;  %438 = vst.msk [vmem:[#allocation3 + $0x28] sm:$0xff] %vm432_vm0, %v1804_v17 }
  0x54   : > { %439 = vst.msk [vmem:[#allocation3 + $0x30] sm:$0xff] %vm432_vm0, %v1804_v17  ;;  %440 = vst.msk [vmem:[#allocation3 + $0x38] sm:$0xff] %vm432_vm0, %v1804_v17 }
  0x55   : > { %441 = vst.msk [vmem:[#allocation3 + $0x40] sm:$0xff] %vm432_vm0, %v1804_v17  ;;  %442 = vst.msk [vmem:[#allocation3 + $0x48] sm:$0xff] %vm432_vm0, %v1804_v17 }
  0x56   : > { %443 = vst.msk [vmem:[#allocation3 + $0x50] sm:$0xff] %vm432_vm0, %v1804_v17  ;;  %444 = vst.msk [vmem:[#allocation3 + $0x58] sm:$0xff] %vm432_vm0, %v1804_v17 }
  0x57   : > { %445 = vst.msk [vmem:[#allocation3 + $0x60] sm:$0xff] %vm432_vm0, %v1804_v17  ;;  %446 = vst.msk [vmem:[#allocation3 + $0x68] sm:$0xff] %vm432_vm0, %v1804_v17 }
  0x58   : > { %447 = vst.msk [vmem:[#allocation3 + $0x70] sm:$0xff] %vm432_vm0, %v1804_v17  ;;  %448 = vst.msk [vmem:[#allocation3 + $0x78] sm:$0xff] %vm432_vm0, %v1804_v17 }
  0x59 PF: > { %v1609_v18 = vld [vmem:[%s1974_s11] sm:$0xff]   ;;  %v1610_v19 = vld [vmem:[%s1974_s11 + $0x8] sm:$0xff]   ;;  %v1611_v20 = vld [vmem:[%s1974_s11 + $0x10] sm:$0xff]   ;;  %vm561_vm1 = vcmask 7168   ;;  %p1372_p10 = scmp.ne.s32.totalorder %s1785_s26, 1 }
  0x5a   : > { %1421 = vmatprep.subr.bf16.mxu0 %v1609_v18  ;;  %1485 = vmatprep.subr.bf16.mxu1 %v1609_v18  ;;  %v1612_v21 = vld [vmem:[%s1974_s11 + $0x18] sm:$0xff]   ;;  %v449_v22 = vld [vmem:[%s1981_s29] sm:$0xff]  ;;  %v450_v23 = vld [vmem:[%s1981_s29 + $0x8] sm:$0xff] }
  0x5b   : > { %1422 = vmatpush3.bf16.msra.mxu0 %v1609_v18  ;;  %1493 = vmatpush3.bf16.msra.mxu1 %v1609_v18  ;;  %v457_v24 = vld [vmem:[%s1981_s29 + $0x40] sm:$0xff]  ;;  %v465_v25 = vmax.f32 %v449_v22, 0.0  ;;  %v466_v26 = vmax.f32 %v450_v23, 0.0  ;;  %v458_v27 = vld [vmem:[%s1981_s29 + $0x48] sm:$0xff]  ;;  %v451_v29 = vld [vmem:[%s1981_s29 + $0x10] sm:$0xff] }
  0x5c   : > { %1423 = vmatprep.subr.bf16.mxu0 %v1610_v19  ;;  %1486 = vmatprep.subr.bf16.mxu1 %v1610_v19  ;;  %v473_v28 = vmax.f32 %v457_v24, 0.0  ;;  %v452_v30 = vld [vmem:[%s1981_s29 + $0x18] sm:$0xff]  ;;  %v474_v31 = vmax.f32 %v458_v27, 0.0  ;;  %v467_v32 = vmax.f32 %v451_v29, 0.0  ;;  %v1613_v36 = vld [vmem:[%s1974_s11 + $0x20] sm:$0xff]   ;;  %v454_v42 = vld [vmem:[%s1981_s29 + $0x28] sm:$0xff] }
  0x5d   : > { %v481_v33 = vmin.f32 %v465_v25, 1.0  ;;  %v482_v34 = vmin.f32 %v466_v26, 1.0  ;;  %v468_v38 = vmax.f32 %v452_v30, 0.0  ;;  %v453_v41 = vld [vmem:[%s1981_s29 + $0x20] sm:$0xff]  ;;  %v1614_v44 = vld [vmem:[%s1974_s11 + $0x28] sm:$0xff]   ;;  %v470_v47 = vmax.f32 %v454_v42, 0.0 }
  0x5e   : > { %v2015_v35 = vmin.f32 %v473_v28, 1.0  ;;  %v2018_v37 = vmin.f32 %v474_v31, 1.0  ;;  %v2020_v39 = vmin.f32 %v467_v32, 1.0  ;;  %v469_v46 = vmax.f32 %v453_v41, 0.0  ;;  %v455_v48 = vld [vmem:[%s1981_s29 + $0x30] sm:$0xff]  ;;  %v456_v49 = vld [vmem:[%s1981_s29 + $0x38] sm:$0xff] }
  0x5f   : > { %1424 = vmatpush3.bf16.msra.mxu0 %v1610_v19  ;;  %1494 = vmatpush3.bf16.msra.mxu1 %v1610_v19  ;;  %v594_v40 = vpack.c.bf16 %v482_v34, %v481_v33  ;;  %v484_v45 = vmin.f32 %v468_v38, 1.0  ;;  %v1615_v50 = vld [vmem:[%s1974_s11 + $0x30] sm:$0xff]   ;;  %v460_v52 = vld [vmem:[%s1981_s29 + $0x58] sm:$0xff]  ;;  %v486_v54 = vmin.f32 %v470_v47, 1.0  ;;  %v461_v55 = vld [vmem:[%s1981_s29 + $0x60] sm:$0xff]  ;;  %v471_v57 = vmax.f32 %v455_v48, 0.0 }
  0x60   : > { %1425 = vmatprep.subr.bf16.mxu0 %v1611_v20  ;;  %1487 = vmatprep.subr.bf16.mxu1 %v1611_v20  ;;  %v598_v43 = vpack.c.bf16 %v2018_v37, %v2015_v35  ;;  %v459_v51 = vld [vmem:[%s1981_s29 + $0x50] sm:$0xff]  ;;  %v485_v53 = vmin.f32 %v469_v46, 1.0  ;;  %v462_v56 = vld [vmem:[%s1981_s29 + $0x68] sm:$0xff]  ;;  %v472_v58 = vmax.f32 %v456_v49, 0.0  ;;  %v476_v60 = vmax.f32 %v460_v52, 0.0  ;;  %v1616_v63 = vld [vmem:[%s1974_s11 + $0x38] sm:$0xff]  }
  0x61   : > { %513 = vadd.xlane.f32.xlu0 %v481_v33  ;;  %517 = vadd.xlane.f32.xlu1 %v2020_v39  ;;  %v475_v59 = vmax.f32 %v459_v51, 0.0  ;;  %v477_v61 = vmax.f32 %v461_v55, 0.0  ;;  %v478_v62 = vmax.f32 %v462_v56, 0.0  ;;  %v487_v0 = vmin.f32 %v471_v57, 1.0  ;;  %v463_v6 = vld [vmem:[%s1981_s29 + $0x70] sm:$0xff]  ;;  %v464_v7 = vld [vmem:[%s1981_s29 + $0x78] sm:$0xff] }
  0x62   : > { %1437 = vmatprep.mubr.bf16.mxu0 %v594_v40  ;;  %1445 = vmatprep.mubr.bf16.mxu1 %v598_v43  ;;  %v488_v1 = vmin.f32 %v472_v58, 1.0  ;;  %v492_v3 = vmin.f32 %v476_v60, 1.0  ;;  %v595_v8 = vpack.c.bf16 %v484_v45, %v2020_v39  ;;  %v479_v10 = vmax.f32 %v463_v6, 0.0  ;;  %v497_v18 = vld [vmem:[#allocation3] sm:$0xff]  ;;  %v499_v19 = vld [vmem:[#allocation3 + $0x10] sm:$0xff]  ;;  %v500_v24 = vld [vmem:[#allocation3 + $0x18] sm:$0xff] }
  0x63   : > { %1426 = vmatpush3.bf16.msra.mxu0 %v1611_v20  ;;  %1495 = vmatpush3.bf16.msra.mxu1 %v1611_v20  ;;  %v491_v2 = vmin.f32 %v475_v59, 1.0  ;;  %v493_v4 = vmin.f32 %v477_v61, 1.0  ;;  %v494_v5 = vmin.f32 %v478_v62, 1.0  ;;  %v480_v11 = vmax.f32 %v464_v7, 0.0  ;;  %v498_v25 = vld [vmem:[#allocation3 + $0x8] sm:$0xff]  ;;  %v501_v31 = vld [vmem:[#allocation3 + $0x20] sm:$0xff] }
  0x64   : > { %1427 = vmatprep.subr.bf16.mxu0 %v1612_v21  ;;  %1488 = vmatprep.subr.bf16.mxu1 %v1612_v21  ;;  %v596_v12 = vpack.c.bf16 %v486_v54, %v485_v53  ;;  %v495_v14 = vmin.f32 %v479_v10, 1.0  ;;  %v597_v16 = vpack.c.bf16 %v488_v1, %v487_v0  ;;  %v502_v30 = vld [vmem:[#allocation3 + $0x28] sm:$0xff]  ;;  %v505_v43 = vld [vmem:[#allocation3 + $0x40] sm:$0xff]  ;;  %v508_v48 = vld [vmem:[#allocation3 + $0x58] sm:$0xff] }
  0x65   : > { %519 = vadd.xlane.f32.xlu1 %v484_v45  ;;  %515 = vadd.xlane.f32.xlu0 %v482_v34  ;;  %v599_v9 = vpack.c.bf16 %v492_v3, %v491_v2  ;;  %v600_v13 = vpack.c.bf16 %v494_v5, %v493_v4  ;;  %v496_v15 = vmin.f32 %v480_v11, 1.0  ;;  %v506_v42 = vld [vmem:[#allocation3 + $0x48] sm:$0xff]  ;;  %v507_v49 = vld [vmem:[#allocation3 + $0x50] sm:$0xff]  ;;  %v509_v55 = vld [vmem:[#allocation3 + $0x60] sm:$0xff] }
  0x66   : > { %v512_v60 = vld [vmem:[#allocation3 + $0x78] sm:$0xff]  ;;  %v511_v61 = vld [vmem:[#allocation3 + $0x70] sm:$0xff] }
  0x67   : > { %1428 = vmatpush3.bf16.msra.mxu0 %v1612_v21  ;;  %1496 = vmatpush3.bf16.msra.mxu1 %v1612_v21  ;;  %v601_v17 = vpack.c.bf16 %v496_v15, %v495_v14 }
  0x68   : > { %1429 = vmatprep.subr.bf16.mxu0 %v1613_v36  ;;  %1489 = vmatprep.subr.bf16.mxu1 %v1613_v36 }
  0x69   : > { %523 = vadd.xlane.f32.xlu1 %v486_v54  ;;  %521 = vadd.xlane.f32.xlu0 %v485_v53  ;;  %v510_v54 = vld [vmem:[#allocation3 + $0x68] sm:$0xff] }
  0x6b   : > { %1430 = vmatpush3.bf16.msra.mxu0 %v1613_v36  ;;  %1497 = vmatpush3.bf16.msra.mxu1 %v1613_v36  ;;  %v504_v36 = vld [vmem:[#allocation3 + $0x38] sm:$0xff] }
  0x6c   : > { %1431 = vmatprep.subr.bf16.mxu0 %v1614_v44  ;;  %1490 = vmatprep.subr.bf16.mxu1 %v1614_v44 }
  0x6d   : > { %527 = vadd.xlane.f32.xlu1 %v488_v1  ;;  %525 = vadd.xlane.f32.xlu0 %v487_v0 }
  0x6f   : > { %1432 = vmatpush3.bf16.msra.mxu0 %v1614_v44  ;;  %1498 = vmatpush3.bf16.msra.mxu1 %v1614_v44 }
  0x70   : > { %1433 = vmatprep.subr.bf16.mxu0 %v1615_v50  ;;  %1491 = vmatprep.subr.bf16.mxu1 %v1615_v50 }
  0x71   : > { %531 = vadd.xlane.f32.xlu1 %v2018_v37  ;;  %529 = vadd.xlane.f32.xlu0 %v2015_v35  ;;  %v503_v37 = vld [vmem:[#allocation3 + $0x30] sm:$0xff] }
  0x73   : > { %1434 = vmatpush3.bf16.msra.mxu0 %v1615_v50  ;;  %1499 = vmatpush3.bf16.msra.mxu1 %v1615_v50 }
  0x74   : > { %1435 = vmatprep.subr.bf16.mxu0 %v1616_v63  ;;  %1492 = vmatprep.subr.bf16.mxu1 %v1616_v63 }
  0x75   : > { %535 = vadd.xlane.f32.xlu1 %v492_v3  ;;  %533 = vadd.xlane.f32.xlu0 %v491_v2  ;;  %v580_v2 = vld [vmem:[#allocation2 + $0x10] sm:$0xff] }
  0x76   : > { %v588_v3 = vld [vmem:[#allocation2 + $0x50] sm:$0xff] }
  0x77   : > { %1436 = vmatpush3.bf16.msra.mxu0 %v1616_v63  ;;  %1500 = vmatpush3.bf16.msra.mxu1 %v1616_v63 }
  0x79   : > { %539 = vadd.xlane.f32.xlu1 %v494_v5  ;;  %537 = vadd.xlane.f32.xlu0 %v493_v4  ;;  %v578_v4 = vld [vmem:[#allocation2] sm:$0xff] }
  0x7a   : > { %1438 = vmatmul.mubr.bf16.vlgmr.msra.gmra.mrb[0].mxu0 %v595_v8  ;;  %1446 = vmatmul.mubr.bf16.vlgmr.msra.gmra.mrb[0].mxu1 %v599_v9  ;;  %v586_v5 = vld [vmem:[#allocation2 + $0x40] sm:$0xff]  ;;  %v581_v8 = vld [vmem:[#allocation2 + $0x18] sm:$0xff] }
  0x7b   : > { %1441 = vmatprep.mubr.bf16.mxu0 %v596_v12  ;;  %1449 = vmatprep.mubr.bf16.mxu1 %v600_v13  ;;  %v589_v9 = vld [vmem:[#allocation2 + $0x58] sm:$0xff] }
  0x7d   : > { %543 = vadd.xlane.f32.xlu1 %v496_v15  ;;  %541 = vadd.xlane.f32.xlu0 %v495_v14  ;;  %v587_v14 = vld [vmem:[#allocation2 + $0x48] sm:$0xff] }
  0x7e   : > { %v579_v15 = vld [vmem:[#allocation2 + $0x8] sm:$0xff] }
  0x82   : > { %1442 = vmatmul.mubr.bf16.gmra.mrb[4].mxu0 %v597_v16  ;;  %1450 = vmatmul.mubr.bf16.gmra.mrb[4].mxu1 %v601_v17 }
  0xee   : > { %v514_v20 = vpop.xlane.xlu0 %513  ;;  %v518_v21 = vpop.xlane.xlu1 %517 }
  0xef   : > { %v545_v22 = vadd.f32 %v514_v20, %v497_v18  ;;  %v547_v23 = vadd.f32 %v518_v21, %v499_v19 }
  0xf1   : > { %562 = vst.msk [vmem:[#allocation3] sm:$0xff] %vm561_vm1, %v545_v22  ;;  %564 = vst.msk [vmem:[#allocation3 + $0x10] sm:$0xff] %vm561_vm1, %v547_v23 }
  0xf2   : > { %v520_v26 = vpop.xlane.xlu1 %519  ;;  %v516_v27 = vpop.xlane.xlu0 %515 }
  0xf3   : > { %v548_v28 = vadd.f32 %v520_v26, %v500_v24  ;;  %v546_v29 = vadd.f32 %v516_v27, %v498_v25  ;;  %v584_v26 = vld [vmem:[#allocation2 + $0x30] sm:$0xff] }
  0xf4   : > { %v592_v27 = vld [vmem:[#allocation2 + $0x70] sm:$0xff] }
  0xf5   : > { %565 = vst.msk [vmem:[#allocation3 + $0x18] sm:$0xff] %vm561_vm1, %v548_v28  ;;  %563 = vst.msk [vmem:[#allocation3 + $0x8] sm:$0xff] %vm561_vm1, %v546_v29  ;;  %v582_v28 = vld [vmem:[#allocation2 + $0x20] sm:$0xff] }
  0xf6   : > { %v524_v32 = vpop.xlane.xlu1 %523  ;;  %v522_v33 = vpop.xlane.xlu0 %521  ;;  %v590_v29 = vld [vmem:[#allocation2 + $0x60] sm:$0xff] }
  0xf7   : > { %v550_v34 = vadd.f32 %v524_v32, %v502_v30  ;;  %v549_v35 = vadd.f32 %v522_v33, %v501_v31  ;;  %v585_v32 = vld [vmem:[#allocation2 + $0x38] sm:$0xff] }
  0xf8   : > { %v593_v33 = vld [vmem:[#allocation2 + $0x78] sm:$0xff] }
  0xf9   : > { %567 = vst.msk [vmem:[#allocation3 + $0x28] sm:$0xff] %vm561_vm1, %v550_v34  ;;  %566 = vst.msk [vmem:[#allocation3 + $0x20] sm:$0xff] %vm561_vm1, %v549_v35 }
  0xfa   : > { %v528_v38 = vpop.xlane.xlu1 %527  ;;  %v526_v39 = vpop.xlane.xlu0 %525 }
  0xfb   : > { %v552_v40 = vadd.f32 %v528_v38, %v504_v36  ;;  %v551_v41 = vadd.f32 %v526_v39, %v503_v37  ;;  %v591_v38 = vld [vmem:[#allocation2 + $0x68] sm:$0xff] }
  0xfc   : > { %v583_v39 = vld [vmem:[#allocation2 + $0x28] sm:$0xff] }
  0xfd   : > { %569 = vst.msk [vmem:[#allocation3 + $0x38] sm:$0xff] %vm561_vm1, %v552_v40  ;;  %568 = vst.msk [vmem:[#allocation3 + $0x30] sm:$0xff] %vm561_vm1, %v551_v41 }
  0xfe   : > { %v532_v44 = vpop.xlane.xlu1 %531  ;;  %v530_v45 = vpop.xlane.xlu0 %529 }
  0xff   : > { %v554_v46 = vadd.f32 %v532_v44, %v506_v42  ;;  %v553_v47 = vadd.f32 %v530_v45, %v505_v43 }
 0x101   : > { %571 = vst.msk [vmem:[#allocation3 + $0x48] sm:$0xff] %vm561_vm1, %v554_v46  ;;  %570 = vst.msk [vmem:[#allocation3 + $0x40] sm:$0xff] %vm561_vm1, %v553_v47 }
 0x102   : > { %v536_v50 = vpop.xlane.xlu1 %535  ;;  %v534_v51 = vpop.xlane.xlu0 %533 }
 0x103   : > { %v556_v52 = vadd.f32 %v536_v50, %v508_v48  ;;  %v555_v53 = vadd.f32 %v534_v51, %v507_v49  ;;  %v801_v50 = vld [vmem:[#allocation3 + $0x10] sm:$0xff] (!%p1372_p10)  ;;  %v799_v51 = vld [vmem:[#allocation3] sm:$0xff] (!%p1372_p10) }
 0x105   : > { %573 = vst.msk [vmem:[#allocation3 + $0x58] sm:$0xff] %vm561_vm1, %v556_v52  ;;  %572 = vst.msk [vmem:[#allocation3 + $0x50] sm:$0xff] %vm561_vm1, %v555_v53  ;;  %v802_v52 = vld [vmem:[#allocation3 + $0x18] sm:$0xff] (!%p1372_p10)  ;;  %v1805_v53 = vmov (!%p1372_p10), 0  }
 0x106   : > { %v540_v56 = vpop.xlane.xlu1 %539  ;;  %v538_v57 = vpop.xlane.xlu0 %537  ;;  %1618 = vset.pattern.permute.xlu1 (!%p1372_p10), %v1805_v53  ;;  %1617 = vset.pattern.permute.xlu0 (!%p1372_p10), %v1805_v53 }
 0x107   : > { %v558_v58 = vadd.f32 %v540_v56, %v510_v54  ;;  %v557_v59 = vadd.f32 %v538_v57, %v509_v55  ;;  %v817_v54 = vadd.f32 (!%p1372_p10), 1e-08, %v801_v50  ;;  %v815_v55 = vadd.f32 (!%p1372_p10), 1e-08, %v799_v51  ;;  %v800_v57 = vld [vmem:[#allocation3 + $0x8] sm:$0xff] (!%p1372_p10)  ;;  %v849_v50 = vld [vmem:[%s1979_s10 + $0x10] sm:$0xff] (!%p1372_p10) }
 0x108   : > { %v818_v56 = vadd.f32 (!%p1372_p10), 1e-08, %v802_v52  ;;  %v850_v52 = vld [vmem:[%s1979_s10 + $0x18] sm:$0xff] (!%p1372_p10) }
 0x109   : > { %575 = vst.msk [vmem:[#allocation3 + $0x68] sm:$0xff] %vm561_vm1, %v558_v58  ;;  %574 = vst.msk [vmem:[#allocation3 + $0x60] sm:$0xff] %vm561_vm1, %v557_v59  ;;  %v804_v58 = vld [vmem:[#allocation3 + $0x28] sm:$0xff] (!%p1372_p10)  ;;  %1627 = vrcp.f32 (!%p1372_p10), %v817_v54  ;;  %v816_v59 = vadd.f32 (!%p1372_p10), 1e-08, %v800_v57 }
 0x10a   : > { %v544_v62 = vpop.xlane.xlu1 %543  ;;  %v542_v63 = vpop.xlane.xlu0 %541  ;;  %1629 = vrcp.f32 (!%p1372_p10), %v815_v55  ;;  %v848_v57 = vld [vmem:[%s1979_s10 + $0x8] sm:$0xff] (!%p1372_p10) }
 0x10b   : > { %v560_v0 = vadd.f32 %v544_v62, %v512_v60  ;;  %v559_v1 = vadd.f32 %v542_v63, %v511_v61  ;;  %v803_v60 = vld [vmem:[#allocation3 + $0x20] sm:$0xff] (!%p1372_p10)  ;;  %1631 = vrcp.f32 (!%p1372_p10), %v818_v56  ;;  %v820_v61 = vadd.f32 (!%p1372_p10), 1e-08, %v804_v58  ;;  %v806_v63 = vld [vmem:[#allocation3 + $0x38] sm:$0xff] (!%p1372_p10) }
 0x10c   : > { %1633 = vrcp.f32 (!%p1372_p10), %v816_v59  ;;  %v819_v62 = vadd.f32 (!%p1372_p10), 1e-08, %v803_v60  ;;  %v847_v56 = vld [vmem:[%s1979_s10] sm:$0xff] (!%p1372_p10) }
 0x10d   : > { %577 = vst.msk [vmem:[#allocation3 + $0x78] sm:$0xff] %vm561_vm1, %v560_v0  ;;  %576 = vst.msk [vmem:[#allocation3 + $0x70] sm:$0xff] %vm561_vm1, %v559_v1  ;;  %v805_v0 = vld [vmem:[#allocation3 + $0x30] sm:$0xff] (!%p1372_p10)  ;;  %v808_v1 = vld [vmem:[#allocation3 + $0x48] sm:$0xff] (!%p1372_p10)  ;;  %1635 = vrcp.f32 (!%p1372_p10), %v820_v61 }
 0x10e   : > { %1637 = vrcp.f32 (!%p1372_p10), %v819_v62 }
 0x14d   : > { %v1439_v6 = vpop.f32.mrb[0].mxu0  ;;  %v1447_v7 = vpop.f32.mrb[0].mxu1 }
 0x14e   : > { %v765_v10 = vadd.f32 %v1439_v6, %v580_v2  ;;  %v773_v11 = vadd.f32 %v1447_v7, %v588_v3  ;;  %v700_v12 = vpop.f32.mrb[1].mxu0  ;;  %v732_v13 = vpop.f32.mrb[1].mxu1  ;;  %v822_v2 = vadd.f32 (!%p1372_p10), 1e-08, %v806_v63  ;;  %v821_v3 = vadd.f32 (!%p1372_p10), 1e-08, %v805_v0 }
 0x14f   : > { %v763_v16 = vadd.f32 %v700_v12, %v578_v4  ;;  %v771_v17 = vadd.f32 %v732_v13, %v586_v5  ;;  %v1440_v18 = vpop.f32.mrb[2].mxu0  ;;  %v1448_v19 = vpop.f32.mrb[2].mxu1  ;;  %v807_v4 = vld [vmem:[#allocation3 + $0x40] sm:$0xff] (!%p1372_p10)  ;;  %v824_v5 = vadd.f32 (!%p1372_p10), 1e-08, %v808_v1  ;;  %v1620_v7 = vld [vmem:[%s2213_s3 + $0x8] sm:$0xff] (!%p1372_p10)  }
 0x150   : > { %781 = vst [vmem:[#allocation2 + $0x10] sm:$0xff] %v765_v10  ;;  %789 = vst [vmem:[#allocation2 + $0x50] sm:$0xff] %v773_v11  ;;  %v766_v20 = vadd.f32 %v1440_v18, %v581_v8  ;;  %v774_v21 = vadd.f32 %v1448_v19, %v589_v9  ;;  %v735_v22 = vpop.f32.mrb[3].mxu1  ;;  %v703_v23 = vpop.f32.mrb[3].mxu0  ;;  %v1619_v6 = vld [vmem:[%s2213_s3] sm:$0xff] (!%p1372_p10)   ;;  %v810_v8 = vld [vmem:[#allocation3 + $0x58] sm:$0xff] (!%p1372_p10)  ;;  %1639 = vrcp.f32 (!%p1372_p10), %v822_v2 }
 0x151   : > { %779 = vst [vmem:[#allocation2] sm:$0xff] %v763_v16  ;;  %787 = vst [vmem:[#allocation2 + $0x40] sm:$0xff] %v771_v17  ;;  %v772_v24 = vadd.f32 %v735_v22, %v587_v14  ;;  %v764_v25 = vadd.f32 %v703_v23, %v579_v15  ;;  %v1628_v9 = vpop.eup (!%p1372_p10), %1627  ;;  %v809_v10 = vld [vmem:[#allocation3 + $0x50] sm:$0xff] (!%p1372_p10)  ;;  %1453 = vmatprep.subr.bf16.mxu0 (!%p1372_p10), %v1619_v6  ;;  %1501 = vmatprep.subr.bf16.mxu1 (!%p1372_p10), %v1619_v6  ;;  %1641 = vrcp.f32 (!%p1372_p10), %v821_v3  ;;  %v812_v18 = vld [vmem:[#allocation3 + $0x68] sm:$0xff] (!%p1372_p10) }
 0x152   : > { %782 = vst [vmem:[#allocation2 + $0x18] sm:$0xff] %v766_v20  ;;  %790 = vst [vmem:[#allocation2 + $0x58] sm:$0xff] %v774_v21  ;;  %v1630_v11 = vpop.eup (!%p1372_p10), %1629  ;;  %891 = vperm.xlu1 (!%p1372_p10), %1618, %v1628_v9   ;;  %v823_v12 = vadd.f32 (!%p1372_p10), 1e-08, %v807_v4  ;;  %1454 = vmatpush3.bf16.msra.mxu0 (!%p1372_p10), %v1619_v6  ;;  %v1621_v14 = vld [vmem:[%s2213_s3 + $0x10] sm:$0xff] (!%p1372_p10)   ;;  %1643 = vrcp.f32 (!%p1372_p10), %v824_v5  ;;  %v811_v19 = vld [vmem:[#allocation3 + $0x60] sm:$0xff] (!%p1372_p10) }
 0x153   : > { %788 = vst [vmem:[#allocation2 + $0x48] sm:$0xff] %v772_v24  ;;  %780 = vst [vmem:[#allocation2 + $0x8] sm:$0xff] %v764_v25  ;;  %v1632_v13 = vpop.eup (!%p1372_p10), %1631  ;;  %881 = vperm.xlu0 (!%p1372_p10), %1617, %v1630_v11   ;;  %1455 = vmatprep.subr.bf16.mxu0 (!%p1372_p10), %v1620_v7  ;;  %v826_v16 = vadd.f32 (!%p1372_p10), 1e-08, %v810_v8  ;;  %v825_v17 = vadd.f32 (!%p1372_p10), 1e-08, %v809_v10 }
 0x154   : > { %v1634_v15 = vpop.eup (!%p1372_p10), %1633  ;;  %1509 = vmatpush3.bf16.msra.mxu1 (!%p1372_p10), %v1619_v6  ;;  %1645 = vrcp.f32 (!%p1372_p10), %v823_v12  ;;  %v1622_v21 = vld [vmem:[%s2213_s3 + $0x18] sm:$0xff] (!%p1372_p10)   ;;  %v828_v23 = vadd.f32 (!%p1372_p10), 1e-08, %v812_v18  ;;  %v827_v24 = vadd.f32 (!%p1372_p10), 1e-08, %v811_v19  ;;  %v852_v63 = vld [vmem:[%s1979_s10 + $0x28] sm:$0xff] (!%p1372_p10) }
 0x155   : > { %v1443_v30 = vpop.f32.mrb[4].mxu0  ;;  %v1451_v31 = vpop.f32.mrb[4].mxu1  ;;  %798 = sbr.rel (%p1372_p10) target bundleno = 751 (0x2ef), region = 90  ;;  %1502 = vmatprep.subr.bf16.mxu1 (!%p1372_p10), %v1620_v7  ;;  %1647 = vrcp.f32 (!%p1372_p10), %v826_v16  ;;  %v814_v25 = vld [vmem:[#allocation3 + $0x78] sm:$0xff] (!%p1372_p10)  ;;  %v851_v4 = vld [vmem:[%s1979_s10 + $0x20] sm:$0xff] (!%p1372_p10)  ;;  %v853_v16 = vld [vmem:[%s1979_s10 + $0x30] sm:$0xff] (!%p1372_p10) }
 0x156   : > { %v769_v34 = vadd.f32 %v1443_v30, %v584_v26  ;;  %v777_v35 = vadd.f32 %v1451_v31, %v592_v27  ;;  %v716_v36 = vpop.f32.mrb[5].mxu0  ;;  %v748_v37 = vpop.f32.mrb[5].mxu1  ;;  %896 = vperm.xlu1 (!%p1372_p10), %1618, %v1632_v13   ;;  %1456 = vmatpush3.bf16.msra.mxu0 (!%p1372_p10), %v1620_v7  ;;  %1649 = vrcp.f32 (!%p1372_p10), %v825_v17  ;;  %v813_v27 = vld [vmem:[#allocation3 + $0x70] sm:$0xff] (!%p1372_p10)  ;;  %v830_v30 = vadd.f32 (!%p1372_p10), 1e-08, %v814_v25  ;;  %v854_v13 = vld [vmem:[%s1979_s10 + $0x38] sm:$0xff] (!%p1372_p10) }
 0x157   : > { %v767_v40 = vadd.f32 %v716_v36, %v582_v28  ;;  %v775_v41 = vadd.f32 %v748_v37, %v590_v29  ;;  %v1444_v42 = vpop.f32.mrb[6].mxu0  ;;  %v1452_v43 = vpop.f32.mrb[6].mxu1  ;;  %886 = vperm.xlu0 (!%p1372_p10), %1617, %v1634_v15   ;;  %1457 = vmatprep.subr.bf16.mxu0 (!%p1372_p10), %v1621_v14  ;;  %v1623_v28 = vld [vmem:[%s2213_s3 + $0x20] sm:$0xff] (!%p1372_p10)   ;;  %1651 = vrcp.f32 (!%p1372_p10), %v828_v23  ;;  %v829_v31 = vadd.f32 (!%p1372_p10), 1e-08, %v813_v27  ;;  %v1625_v36 = vld [vmem:[%s2213_s3 + $0x30] sm:$0xff] (!%p1372_p10)  }
 0x158   : > { %785 = vst [vmem:[#allocation2 + $0x30] sm:$0xff] %v769_v34  ;;  %793 = vst [vmem:[#allocation2 + $0x70] sm:$0xff] %v777_v35  ;;  %v770_v44 = vadd.f32 %v1444_v42, %v585_v32  ;;  %v778_v45 = vadd.f32 %v1452_v43, %v593_v33  ;;  %v751_v46 = vpop.f32.mrb[7].mxu1  ;;  %v719_v47 = vpop.f32.mrb[7].mxu0  ;;  %1510 = vmatpush3.bf16.msra.mxu1 (!%p1372_p10), %v1620_v7  ;;  %1653 = vrcp.f32 (!%p1372_p10), %v827_v24  ;;  %v1624_v33 = vld [vmem:[%s2213_s3 + $0x28] sm:$0xff] (!%p1372_p10)   ;;  %v865_v43 = vld [vmem:[#allocation2 + $0x10] sm:$0xff] (!%p1372_p10) }
 0x159   : > { %783 = vst [vmem:[#allocation2 + $0x20] sm:$0xff] %v767_v40  ;;  %791 = vst [vmem:[#allocation2 + $0x60] sm:$0xff] %v775_v41  ;;  %v776_v48 = vadd.f32 %v751_v46, %v591_v38  ;;  %v768_v49 = vadd.f32 %v719_v47, %v583_v39  ;;  %v1636_v20 = vpop.eup (!%p1372_p10), %1635  ;;  %1503 = vmatprep.subr.bf16.mxu1 (!%p1372_p10), %v1621_v14  ;;  %1655 = vrcp.f32 (!%p1372_p10), %v830_v30  ;;  %v1626_v39 = vld [vmem:[%s2213_s3 + $0x38] sm:$0xff] (!%p1372_p10)   ;;  %v856_v25 = vld [vmem:[%s1979_s10 + $0x48] sm:$0xff] (!%p1372_p10) }
 0x15a   : > { %786 = vst [vmem:[#allocation2 + $0x38] sm:$0xff] %v770_v44  ;;  %794 = vst [vmem:[#allocation2 + $0x78] sm:$0xff] %v778_v45  ;;  %v1638_v22 = vpop.eup (!%p1372_p10), %1637  ;;  %906 = vperm.xlu1 (!%p1372_p10), %1618, %v1636_v20   ;;  %1458 = vmatpush3.bf16.msra.mxu0 (!%p1372_p10), %v1621_v14  ;;  %1657 = vrcp.f32 (!%p1372_p10), %v829_v31  ;;  %v863_v45 = vld [vmem:[#allocation2] sm:$0xff] (!%p1372_p10)  ;;  %v866_v47 = vld [vmem:[#allocation2 + $0x18] sm:$0xff] (!%p1372_p10) }
 0x15b   : > { %792 = vst [vmem:[#allocation2 + $0x68] sm:$0xff] %v776_v48  ;;  %784 = vst [vmem:[#allocation2 + $0x28] sm:$0xff] %v768_v49  ;;  %v1640_v26 = vpop.eup (!%p1372_p10), %1639  ;;  %901 = vperm.xlu0 (!%p1372_p10), %1617, %v1638_v22   ;;  %1459 = vmatprep.subr.bf16.mxu0 (!%p1372_p10), %v1622_v21  ;;  %v864_v49 = vld [vmem:[#allocation2 + $0x8] sm:$0xff] (!%p1372_p10)  ;;  %v871_v22 = vld [vmem:[#allocation2 + $0x40] sm:$0xff] (!%p1372_p10) }
 0x15c   : > { %v1642_v29 = vpop.eup %1641  ;;  %1511 = vmatpush3.bf16.msra.mxu1 %v1621_v14  ;;  %v872_v20 = vld [vmem:[#allocation2 + $0x48] sm:$0xff]  ;;  %v874_v30 = vld [vmem:[#allocation2 + $0x58] sm:$0xff] }
 0x15d   : > { %1504 = vmatprep.subr.bf16.mxu1 %v1622_v21  ;;  %v1644_v32 = vpop.eup %1643 }
 0x15e   : > { %916 = vperm.xlu1 %1618, %v1640_v26   ;;  %1460 = vmatpush3.bf16.msra.mxu0 %v1622_v21  ;;  %v1646_v34 = vpop.eup %1645 }
 0x15f   : > { %911 = vperm.xlu0 %1617, %v1642_v29   ;;  %1461 = vmatprep.subr.bf16.mxu0 %v1623_v28  ;;  %v1648_v35 = vpop.eup %1647  ;;  %v869_v11 = vld [vmem:[#allocation2 + $0x30] sm:$0xff] }
 0x160   : > { %1512 = vmatpush3.bf16.msra.mxu1 %v1622_v21  ;;  %v1650_v37 = vpop.eup %1649  ;;  %v867_v62 = vld [vmem:[#allocation2 + $0x20] sm:$0xff] }
 0x161   : > { %1505 = vmatprep.subr.bf16.mxu1 %v1623_v28  ;;  %v1652_v38 = vpop.eup %1651  ;;  %v870_v9 = vld [vmem:[#allocation2 + $0x38] sm:$0xff] }
 0x162   : > { %926 = vperm.xlu1 %1618, %v1644_v32   ;;  %1462 = vmatpush3.bf16.msra.mxu0 %v1623_v28  ;;  %v1654_v40 = vpop.eup %1653  ;;  %v868_v59 = vld [vmem:[#allocation2 + $0x28] sm:$0xff]  ;;  %v873_v32 = vld [vmem:[#allocation2 + $0x50] sm:$0xff] }
 0x163   : > { %921 = vperm.xlu0 %1617, %v1646_v34   ;;  %1463 = vmatprep.subr.bf16.mxu0 %v1624_v33  ;;  %v1656_v41 = vpop.eup %1655  ;;  %v858_v34 = vld [vmem:[%s1979_s10 + $0x58] sm:$0xff] }
 0x164   : > { %1513 = vmatpush3.bf16.msra.mxu1 %v1623_v28  ;;  %v1658_v42 = vpop.eup %1657  ;;  %v855_v28 = vld [vmem:[%s1979_s10 + $0x40] sm:$0xff] }
 0x165   : > { %1506 = vmatprep.subr.bf16.mxu1 %v1624_v33 }
 0x166   : > { %936 = vperm.xlu1 %1618, %v1648_v35   ;;  %1464 = vmatpush3.bf16.msra.mxu0 %v1624_v33 }
 0x167   : > { %931 = vperm.xlu0 %1617, %v1650_v37   ;;  %1465 = vmatprep.subr.bf16.mxu0 %v1625_v36 }
 0x168   : > { %1514 = vmatpush3.bf16.msra.mxu1 %v1624_v33 }
 0x169   : > { %1507 = vmatprep.subr.bf16.mxu1 %v1625_v36 }
 0x16a   : > { %946 = vperm.xlu1 %1618, %v1652_v38   ;;  %1466 = vmatpush3.bf16.msra.mxu0 %v1625_v36  ;;  %v857_v38 = vld [vmem:[%s1979_s10 + $0x50] sm:$0xff] }
 0x16b   : > { %941 = vperm.xlu0 %1617, %v1654_v40   ;;  %1467 = vmatprep.subr.bf16.mxu0 %v1626_v39 }
 0x16c   : > { %1515 = vmatpush3.bf16.msra.mxu1 %v1625_v36 }
 0x16d   : > { %1508 = vmatprep.subr.bf16.mxu1 %v1626_v39 }
 0x16e   : > { %956 = vperm.xlu1 %1618, %v1656_v41   ;;  %1468 = vmatpush3.bf16.msra.mxu0 %v1626_v39 }
 0x16f   : > { %951 = vperm.xlu0 %1617, %v1658_v42   ;;  %v876_v42 = vld [vmem:[#allocation2 + $0x68] sm:$0xff] }
 0x170   : > { %1516 = vmatpush3.bf16.msra.mxu1 %v1626_v39 }
 0x1d1   : > { %v892_v44 = vpop.permute.xlu1 %891 }
 0x1d2   : > { %v882_v46 = vpop.permute.xlu0 %881  ;;  %v961_v48 = vmul.f32 %v892_v44, %v865_v43  ;;  %v875_v44 = vld [vmem:[#allocation2 + $0x60] sm:$0xff] }
 0x1d3   : > { %v959_v51 = vmul.f32 %v882_v46, %v863_v45  ;;  %v860_v46 = vld [vmem:[%s1979_s10 + $0x68] sm:$0xff] }
 0x1d4   : > { %v977_v60 = vadd.f32 %v961_v48, %v849_v50 }
 0x1d5   : > { %v897_v53 = vpop.permute.xlu1 %896  ;;  %v975_v1 = vadd.f32 %v959_v51, %v847_v56 }
 0x1d6   : > { %v962_v54 = vmul.f32 %v897_v53, %v866_v47  ;;  %v887_v55 = vpop.permute.xlu0 %886  ;;  %v878_v53 = vld [vmem:[#allocation2 + $0x78] sm:$0xff] }
 0x1d7   : > { %v960_v58 = vmul.f32 %v887_v55, %v864_v49  ;;  %v859_v49 = vld [vmem:[%s1979_s10 + $0x60] sm:$0xff]  ;;  %v877_v55 = vld [vmem:[#allocation2 + $0x70] sm:$0xff] }
 0x1d8   : > { %v978_v61 = vadd.f32 %v962_v54, %v850_v52 }
 0x1d9   : > { %v907_v0 = vpop.permute.xlu1 %906  ;;  %v976_v2 = vadd.f32 %v960_v58, %v848_v57  ;;  %v862_v57 = vld [vmem:[%s1979_s10 + $0x78] sm:$0xff] }
 0x1da   : > { %v964_v3 = vmul.f32 %v907_v0, %v868_v59  ;;  %v902_v5 = vpop.permute.xlu0 %901  ;;  %v992_v6 = vpack.c.bf16 %v978_v61, %v977_v60  ;;  %v861_v60 = vld [vmem:[%s1979_s10 + $0x70] sm:$0xff] }
 0x1db   : > { %v963_v7 = vmul.f32 %v902_v5, %v867_v62  ;;  %v991_v8 = vpack.c.bf16 %v976_v2, %v975_v1 }
 0x1dc   : > { %v980_v10 = vadd.f32 %v964_v3, %v852_v63  ;;  %v2101_v3 = vld [vmem:[%s2214_s4] ss:$0 sm:$0xff] }
 0x1dd   : > { %v979_v12 = vadd.f32 %v963_v7, %v851_v4  ;;  %1469 = vmatprep.mubr.bf16.mxu0 %v991_v8  ;;  %v917_v14 = vpop.permute.xlu1 %916 }
 0x1de   : > { %v966_v15 = vmul.f32 %v917_v14, %v870_v9  ;;  %1470 = vmatmul.mubr.bf16.vlgmr.msra.gmra.mrb[0].mxu0 %v992_v6  ;;  %v912_v17 = vpop.permute.xlu0 %911 }
 0x1df   : > { %v965_v18 = vmul.f32 %v912_v17, %v869_v11  ;;  %v993_v19 = vpack.c.bf16 %v980_v10, %v979_v12 }
 0x1e0   : > { %v982_v21 = vadd.f32 %v966_v15, %v854_v13 }
 0x1e1   : > { %v981_v23 = vadd.f32 %v965_v18, %v853_v16  ;;  %1473 = vmatprep.mubr.bf16.mxu0 %v993_v19  ;;  %v927_v24 = vpop.permute.xlu1 %926 }
 0x1e2   : > { %v968_v26 = vmul.f32 %v927_v24, %v872_v20  ;;  %v922_v27 = vpop.permute.xlu0 %921 }
 0x1e3   : > { %v967_v29 = vmul.f32 %v922_v27, %v871_v22  ;;  %v994_v31 = vpack.c.bf16 %v982_v21, %v981_v23 }
 0x1e4   : > { %v984_v33 = vadd.f32 %v968_v26, %v856_v25 }
 0x1e5   : > { %v937_v35 = vpop.permute.xlu1 %936  ;;  %v983_v36 = vadd.f32 %v967_v29, %v855_v28 }
 0x1e6   : > { %v970_v37 = vmul.f32 %v937_v35, %v874_v30  ;;  %1474 = vmatmul.mubr.bf16.gmra.mrb[4].mxu0 %v994_v31  ;;  %v932_v39 = vpop.permute.xlu0 %931 }
 0x1e7   : > { %v969_v40 = vmul.f32 %v932_v39, %v873_v32  ;;  %v995_v41 = vpack.c.bf16 %v984_v33, %v983_v36 }
 0x1e8   : > { %v986_v43 = vadd.f32 %v970_v37, %v858_v34 }
 0x1e9   : > { %v985_v45 = vadd.f32 %v969_v40, %v857_v38  ;;  %1477 = vmatprep.mubr.bf16.mxu1 %v995_v41  ;;  %v947_v47 = vpop.permute.xlu1 %946 }
 0x1ea   : > { %v972_v48 = vmul.f32 %v947_v47, %v876_v42  ;;  %v942_v50 = vpop.permute.xlu0 %941 }
 0x1eb   : > { %v971_v51 = vmul.f32 %v942_v50, %v875_v44  ;;  %v996_v52 = vpack.c.bf16 %v986_v43, %v985_v45 }
 0x1ec   : > { %v988_v54 = vadd.f32 %v972_v48, %v860_v46 }
 0x1ed   : > { %v987_v56 = vadd.f32 %v971_v51, %v859_v49  ;;  %1478 = vmatmul.mubr.bf16.vlgmr.msra.gmra.mrb[0].mxu1 %v996_v52  ;;  %v957_v58 = vpop.permute.xlu1 %956 }
 0x1ee   : > { %v974_v59 = vmul.f32 %v957_v58, %v878_v53  ;;  %v952_v61 = vpop.permute.xlu0 %951 }
 0x1ef   : > { %v973_v62 = vmul.f32 %v952_v61, %v877_v55  ;;  %v997_v63 = vpack.c.bf16 %v988_v54, %v987_v56 }
 0x1f0   : > { %v990_v0 = vadd.f32 %v974_v59, %v862_v57 }
 0x1f1   : > { %v989_v1 = vadd.f32 %v973_v62, %v861_v60  ;;  %1481 = vmatprep.mubr.bf16.mxu1 %v997_v63 }
 0x1f3   : > { %v998_v2 = vpack.c.bf16 %v990_v0, %v989_v1 }
 0x1f5   : > { %1482 = vmatmul.mubr.bf16.gmra.mrb[4].mxu1 %v998_v2 }
 0x2b1   : > { %v1471_v4 = vpop.f32.mrb[0].mxu0 }
 0x2b2   : > { %v1113_v5 = vadd.f32 %v1471_v4, %v2101_v3  ;;  %v1104_v6 = vpop.f32.mrb[1].mxu0 }
 0x2b3   : > { %v1105_v7 = vadd.f32 %v2101_v3, %v1104_v6  ;;  %v1472_v8 = vpop.f32.mrb[2].mxu0 }
 0x2b4   : > { %1659 = vtanh.f32 %v1113_v5  ;;  %v1116_v9 = vadd.f32 %v1472_v8, %v2101_v3  ;;  %v1107_v10 = vpop.f32.mrb[3].mxu0  ;;  %v1199_v8 = vld [vmem:[%s2216_s6] sm:$0x1] }
 0x2b5   : > { %1661 = vtanh.f32 %v1105_v7  ;;  %v1108_v11 = vadd.f32 %v2101_v3, %v1107_v10 }
 0x2b6   : > { %1663 = vtanh.f32 %v1116_v9 }
 0x2b7   : > { %1665 = vtanh.f32 %v1108_v11 }
 0x2b9   : > { %v1475_v12 = vpop.f32.mrb[4].mxu0 }
 0x2ba   : > { %v1129_v13 = vadd.f32 %v1475_v12, %v2101_v3  ;;  %v1120_v14 = vpop.f32.mrb[5].mxu0 }
 0x2bb   : > { %v1121_v15 = vadd.f32 %v2101_v3, %v1120_v14  ;;  %v1476_v16 = vpop.f32.mrb[6].mxu0 }
 0x2bc   : > { %1667 = vtanh.f32 %v1129_v13  ;;  %v1132_v17 = vadd.f32 %v1476_v16, %v2101_v3  ;;  %v1123_v18 = vpop.f32.mrb[7].mxu0 }
 0x2bd   : > { %1669 = vtanh.f32 %v1121_v15  ;;  %v1124_v19 = vadd.f32 %v2101_v3, %v1123_v18 }
 0x2be   : > { %v1660_v20 = vpop.eup %1659  ;;  %1671 = vtanh.f32 %v1132_v17 }
 0x2bf   : > { %v1662_v21 = vpop.eup %1661  ;;  %1185 = vst [vmem:[%s1983_s28 + $0x10] sm:$0xff] %v1660_v20  ;;  %1673 = vtanh.f32 %v1124_v19 }
 0x2c0   : > { %v1664_v22 = vpop.eup %1663  ;;  %1183 = vst [vmem:[%s1983_s28] sm:$0xff] %v1662_v21  ;;  %v1479_v23 = vpop.f32.mrb[0].mxu1 }
 0x2c1   : > { %v1666_v24 = vpop.eup %1665  ;;  %1186 = vst [vmem:[%s1983_s28 + $0x18] sm:$0xff] %v1664_v22  ;;  %v1145_v25 = vadd.f32 %v1479_v23, %v2101_v3  ;;  %v1136_v26 = vpop.f32.mrb[1].mxu1 }
 0x2c2   : > { %1184 = vst [vmem:[%s1983_s28 + $0x8] sm:$0xff] %v1666_v24  ;;  %v1200_v27 = vadd.f32 %v1666_v24, %v1662_v21  ;;  %v1137_v28 = vadd.f32 %v2101_v3, %v1136_v26  ;;  %v1480_v29 = vpop.f32.mrb[2].mxu1 }
 0x2c3   : > { %1675 = vtanh.f32 %v1145_v25  ;;  %v1148_v30 = vadd.f32 %v1480_v29, %v2101_v3  ;;  %v1139_v31 = vpop.f32.mrb[3].mxu1 }
 0x2c4   : > { %v1201_v32 = vadd.f32 %v1660_v20, %v1200_v27  ;;  %1677 = vtanh.f32 %v1137_v28  ;;  %v1140_v33 = vadd.f32 %v2101_v3, %v1139_v31 }
 0x2c5   : > { %1679 = vtanh.f32 %v1148_v30 }
 0x2c6   : > { %v1668_v34 = vpop.eup %1667  ;;  %v1202_v35 = vadd.f32 %v1664_v22, %v1201_v32  ;;  %1681 = vtanh.f32 %v1140_v33 }
 0x2c7   : > { %v1670_v36 = vpop.eup %1669  ;;  %1189 = vst [vmem:[%s1983_s28 + $0x30] sm:$0xff] %v1668_v34 }
 0x2c8   : > { %v1672_v37 = vpop.eup %1671  ;;  %1187 = vst [vmem:[%s1983_s28 + $0x20] sm:$0xff] %v1670_v36  ;;  %v1203_v38 = vadd.f32 %v1670_v36, %v1202_v35  ;;  %v1483_v39 = vpop.f32.mrb[4].mxu1 }
 0x2c9   : > { %v1674_v40 = vpop.eup %1673  ;;  %1190 = vst [vmem:[%s1983_s28 + $0x38] sm:$0xff] %v1672_v37  ;;  %v1161_v41 = vadd.f32 %v1483_v39, %v2101_v3  ;;  %v1152_v42 = vpop.f32.mrb[5].mxu1 }
 0x2ca   : > { %1188 = vst [vmem:[%s1983_s28 + $0x28] sm:$0xff] %v1674_v40  ;;  %v1204_v43 = vadd.f32 %v1674_v40, %v1203_v38  ;;  %v1153_v44 = vadd.f32 %v2101_v3, %v1152_v42  ;;  %v1484_v45 = vpop.f32.mrb[6].mxu1 }
 0x2cb   : > { %1683 = vtanh.f32 %v1161_v41  ;;  %v1164_v46 = vadd.f32 %v1484_v45, %v2101_v3  ;;  %v1155_v47 = vpop.f32.mrb[7].mxu1 }
 0x2cc   : > { %v1205_v48 = vadd.f32 %v1668_v34, %v1204_v43  ;;  %1685 = vtanh.f32 %v1153_v44  ;;  %v1156_v49 = vadd.f32 %v2101_v3, %v1155_v47 }
 0x2cd   : > { %v1676_v50 = vpop.eup %1675  ;;  %1687 = vtanh.f32 %v1164_v46 }
 0x2ce   : > { %v1678_v51 = vpop.eup %1677  ;;  %1193 = vst [vmem:[%s1983_s28 + $0x50] sm:$0xff] %v1676_v50  ;;  %v1206_v52 = vadd.f32 %v1672_v37, %v1205_v48  ;;  %1689 = vtanh.f32 %v1156_v49 }
 0x2cf   : > { %v1680_v53 = vpop.eup %1679  ;;  %1191 = vst [vmem:[%s1983_s28 + $0x40] sm:$0xff] %v1678_v51 }
 0x2d0   : > { %v1682_v54 = vpop.eup %1681  ;;  %v1207_v55 = vadd.f32 %v1678_v51, %v1206_v52  ;;  %1194 = vst [vmem:[%s1983_s28 + $0x58] sm:$0xff] %v1680_v53 }
 0x2d1   : > { %1192 = vst [vmem:[%s1983_s28 + $0x48] sm:$0xff] %v1682_v54 }
 0x2d2   : > { %v1208_v56 = vadd.f32 %v1682_v54, %v1207_v55 }
 0x2d4   : > { %v1209_v57 = vadd.f32 %v1676_v50, %v1208_v56 }
 0x2d5   : > { %v1684_v58 = vpop.eup %1683 }
 0x2d6   : > { %v1686_v59 = vpop.eup %1685  ;;  %1197 = vst [vmem:[%s1983_s28 + $0x70] sm:$0xff] %v1684_v58  ;;  %v1210_v60 = vadd.f32 %v1680_v53, %v1209_v57 }
 0x2d7   : > { %v1688_v61 = vpop.eup %1687  ;;  %1195 = vst [vmem:[%s1983_s28 + $0x60] sm:$0xff] %v1686_v59 }
 0x2d8   : > { %v1690_v62 = vpop.eup %1689  ;;  %v1211_v63 = vadd.f32 %v1686_v59, %v1210_v60  ;;  %1198 = vst [vmem:[%s1983_s28 + $0x78] sm:$0xff] %v1688_v61 }
 0x2d9   : > { %1196 = vst [vmem:[%s1983_s28 + $0x68] sm:$0xff] %v1690_v62 }
 0x2da   : > { %v1212_v0 = vadd.f32 %v1690_v62, %v1211_v63 }
 0x2dc   : > { %v1213_v1 = vadd.f32 %v1684_v58, %v1212_v0 }
 0x2de   : > { %v1214_v2 = vadd.f32 %v1688_v61, %v1213_v1 }
 0x2e0   : > { %v1215_v3 = vrot.slane %v1214_v2, 4 }
 0x2e2   : > { %v1216_v4 = vadd.f32 %v1215_v3, %v1214_v2 }
 0x2e4   : > { %v1217_v5 = vrot.slane %v1216_v4, 2 }
 0x2e6   : > { %v1218_v6 = vadd.f32 %v1217_v5, %v1216_v4 }
 0x2e8   : > { %v1219_v7 = vrot.slane %v1218_v6, 1 }
 0x2ea   : > { %v1220_v9 = vadd.f32 %v1219_v7, %v1218_v6 }
 0x2ec   : > { %v1221_v10 = vadd.f32 %v1220_v9, %v1199_v8 }
 0x2ee   : > { %1222 = vst [vmem:[%s2216_s6] sm:$0x1] %v1221_v10 }
 0x2ef PF: > { %s1388_s16 = sshll.u32 %s1789_s27, 11  ;;  %s1237_s24 = sshll.u32 %s1983_s28, 4  ;;  %s2148_s24 = int_to_ptr.vmem [resolvable:$true] %s1237_s24 }
 0x2f0   : > { %s2145_s11 = scalar_lea.hbm %s2215_s5, %s1388_s16  ;;  %s2232_s9 = sand.u32 1, %s1769_s22  }
 0x2f1   : > { %s2152_s8 = scalar_lea.sflag [#allocation6], %s2232_s9  ;;  %s1691_s0 = scalar_lea.vmem %s2148_s24, 2048 }
 0x2f2   : > { %p1692_p11 = scmp.ne.s32.totalorder %s2148_s24, %s1691_s0  ;;  %s1806_s27 = smov [#allocation5]  }
 0x2f3   : > { %s1695_s26 = sshll.u32 %s1806_s27, 4  ;;  %s1696_s26 = int_to_ptr.vmem [resolvable:$false] %s1695_s26 }
 0x2f4   : > { %p1693_p13 = pnand %p1692_p11, %p1916_p7  ;;  %s1697_s29 = scalar_lea.vmem %s1696_s26, 4096 }
 0x2f5   : > { %p1698_p1 = scmp.lt.s32.totalorder %s2148_s24, %s1696_s26  ;;  %p1699_p2 = scmp.lt.s32.totalorder %s1697_s29, %s1691_s0 }
 0x2f6   : > { %p1694_p0 = pneg %p1693_p13 }
 0x2f7   : > { %p1700_p3 = por %p1699_p2, %p1698_p1 }
 0x2f9   : > { %p1701_p4 = pnand %p1700_p3, %p1694_p0 }
 0x2fb   : > { %1704 = shalt.err (!%p1701_p4)
}
 0x2fc   : > { %s1705_s28 = scalar_lea.hbm %s2145_s11, 2048  ;;  %s1709_s13 = scalar_lea.hbm %s2215_s5, 4096 }
 0x2fd   : > { %p1706_p5 = scmp.ne.s32.totalorder %s2145_s11, %s1705_s28  ;;  %p1710_p9 = scmp.lt.u32.totalorder %s2145_s11, %s2215_s5 }
 0x2fe   : > { %p1711_p10 = scmp.lt.u32.totalorder %s1709_s13, %s1705_s28  ;;  %p1713_p13 = scmp.lt.u32.totalorder %s1705_s28, %s2145_s11 }
 0x2ff   : > { %p1707_p6 = pnand %p1706_p5, %p1916_p7 }
 0x300   : > { %p1712_p11 = por %p1711_p10, %p1710_p9 }
 0x301   : > { %p1708_p8 = pneg %p1707_p6 }
 0x302   : > { %p1714_p0 = por %p1713_p13, %p1712_p11 }
 0x304   : > { %p1715_p1 = pnand %p1714_p0, %p1708_p8 }
 0x306   : > { %1718 = shalt.err (!%p1715_p1)
}
 0x307   : > { %s1807_s16 = smov 128   ;;  %s1808_s17 = smov 8  }
 0x308   : > { %1517 = dma.vmem_to_hbm [thread:$0]  (%p1916_p7), %s2148_s24, 2048, %s2145_s11, %s2152_s8, %s1807_s16, %s1807_s16, %s1808_s17  }
 0x309 PF: > { %p1523_p2 = scmp.ge.s32.totalorder %s1801_s30, 2  ;;  %s1258_s14 = sand.u32 1, %s1765_s21  }
 0x30a   : > { %s1259_s9 = scalar_lea.sflag [#allocation6], %s1258_s14 }
 0x30b   : > { %p1520_p3 = pnand %p1523_p2, %p1924_p12 }
 0x30d   : > { %1760 = dma.done.wait (!%p1520_p3), %s1259_s9, 2048  }
 0x30e   : > { %1762 = vsyncadd (!%p1520_p3), %s1259_s9, 4294965248  ;;  %s20_s30 = sadd.s32 1, %s1801_s30   ;;  %s2233_s15 = sld [smem:[#allocation12_spill]] }
 0x30f   : > { %p17_p4 = scmp.ge.s32.totalorder %s20_s30, 6   ;;  %s2234_s26 = sld [smem:[#allocation8_spill]] }
 0x310   : > { %s2235_s27 = sld [smem:[#allocation9_spill]]  ;;  %s2236_s28 = sld [smem:[#allocation10_spill]] }
 0x311   : > { %s2237_s29 = sld [smem:[#allocation11_spill]]  ;;  %s2238_s21 = smov %s1769_s22 }
 0x312   : > { %s2239_s22 = smov %s1773_s23  ;;  %s2240_s23 = smov %s1929_s19 }
 0x313   : > { %s2241_s24 = smov %s1781_s25  ;;  %19 = sbr.rel (!%p17_p4) target bundleno = 8 (0x8), region = 144 }
 0x314   : > { %s2242_s25 = smov %s2233_s15 }
 0x31a   :  { %1264 = vsyncpa [#allocation6], 1 }
 0x31b   :  { %1266 = vsyncpa [#allocation6 + $0x1], 1 }

</bundles_post_ra>
